<compile_context>
chip_gen: v7x
topology: tpu7x:2x2x1
jax: 0.10.0
libtpu: 0.0.40
codegen_flags: <defaults>
</compile_context>

<pallas_src>
import jax
import jax.numpy as jnp
from jax.experimental import pallas as pl
from jax.experimental.pallas import tpu as pltpu


LANE = 128
SUBLANE_BF16 = 16      # bf16 native (sublane, lane) tile is (16, 128)
B_HALT_IDX = 3         # position of the (1,1) SMEM scalar in the weights tuple


def _round_up(n, m):
    return (n + m - 1) // m * m


def _cdiv(a, b):
    return (a + b - 1) // b


# ---------------------------------------------------------------------------
# Kernel
# ---------------------------------------------------------------------------
def _amp_kernel(
    x_ref,                                                 # (TM, Din) bf16
    w_in_ref, b_in_ref, w_halt_ref, b_halt_ref,            # AdaptiveComputation
    wm1_ref, bm1_ref, wm2_ref, bm2_ref,                    # MetaLearningModule
    we1a_ref, be1a_ref, we2a_ref, be2a_ref,                # EvolutionaryLayer 0
    we1b_ref, be1b_ref, we2b_ref, be2b_ref,                # EvolutionaryLayer 1
    wo1_ref, bo1_ref, wo2_ref, bo2_ref,                    # output head
    o_ref,                                                 # (TM, Hp) bf16
):
    f32 = jnp.float32
    bf16 = jnp.bfloat16

    def dense(a_bf16, w_ref, b_ref):
        # MXU bf16 x bf16 -> f32 accumulate; bias add on the VPU in f32.
        return jnp.dot(a_bf16, w_ref[...], preferred_element_type=f32) + b_ref[...]

    x = x_ref[...]  # already bf16

    # --- AdaptiveComputation (single halting step; matches the reference) ---
    h = jnp.maximum(dense(x, w_in_ref, b_in_ref), 0.0)            # (TM, Hp) f32
    # Halting logit: elementwise mul (VPU) + lane reduce (XLU); scalar bias
    # comes from SMEM. Intentionally NOT a (Hp, 1) matmul.
    p_logit = (
        jnp.sum(h * w_halt_ref[...], axis=-1, keepdims=True) + b_halt_ref[0, 0]
    )
    p = jax.nn.sigmoid(p_logit)                                    # (TM, 1) f32
    h = h * p                                                      # f32 residual stream
    hb = h.astype(bf16)

    # --- MetaLearningModule (2-layer MLP) ---
    t = jnp.maximum(dense(hb, wm1_ref, bm1_ref), 0.0).astype(bf16)
    h = dense(t, wm2_ref, bm2_ref)
    hb = h.astype(bf16)

    # --- EvolutionaryLayer 0 (residual MLP) ---
    t = jnp.maximum(dense(hb, we1a_ref, be1a_ref), 0.0).astype(bf16)
    h = h + dense(t, we2a_ref, be2a_ref)
    hb = h.astype(bf16)

    # --- EvolutionaryLayer 1 (residual MLP) ---
    t = jnp.maximum(dense(hb, we1b_ref, be1b_ref), 0.0).astype(bf16)
    h = h + dense(t, we2b_ref, be2b_ref)
    hb = h.astype(bf16)

    # --- output head: Linear -> ReLU -> Dropout(eval = identity) -> Linear ---
    t = jnp.maximum(dense(hb, wo1_ref, bo1_ref), 0.0).astype(bf16)
    # TODO(synk): Dropout is a no-op in eval mode; training-mode dropout would
    # use pltpu.prng_seed / pltpu.prng_random_bits.
    h = dense(t, wo2_ref, bo2_ref)

    o_ref[...] = h.astype(o_ref.dtype)


# ---------------------------------------------------------------------------
# Wrapper
# ---------------------------------------------------------------------------
def prepare_weights(params, *, compute_dtype=jnp.bfloat16):
    """Pad/cast all weights once (hoist out of the per-forward hot path)."""
    p = params
    H = p["w_in"].shape[1]
    Hp = _round_up(H, LANE)
    f32 = jnp.float32

    def pad_cols(a):
        return jnp.pad(a, ((0, 0), (0, Hp - a.shape[-1])))

    def pad_mat(a):  # (H, H) -> (Hp, Hp)
        return jnp.pad(a, ((0, Hp - a.shape[0]), (0, Hp - a.shape[1])))

    weights = (
        pad_cols(p["w_in"]).astype(compute_dtype),   # (Din, Hp)   MXU
        pad_cols(p["b_in"]).astype(f32),             # (1, Hp)     VPU
        pad_cols(p["w_halt"]).astype(f32),           # (1, Hp)     VPU/XLU path
        p["b_halt"].astype(f32),                     # (1, 1)      SMEM scalar
        pad_mat(p["wm1"]).astype(compute_dtype), pad_cols(p["bm1"]).astype(f32),
        pad_mat(p["wm2"]).astype(compute_dtype), pad_cols(p["bm2"]).astype(f32),
        pad_mat(p["we1a"]).astype(compute_dtype), pad_cols(p["be1a"]).astype(f32),
        pad_mat(p["we2a"]).astype(compute_dtype), pad_cols(p["be2a"]).astype(f32),
        pad_mat(p["we1b"]).astype(compute_dtype), pad_cols(p["be1b"]).astype(f32),
        pad_mat(p["we2b"]).astype(compute_dtype), pad_cols(p["be2b"]).astype(f32),
        pad_mat(p["wo1"]).astype(compute_dtype), pad_cols(p["bo1"]).astype(f32),
        pad_mat(p["wo2"]).astype(compute_dtype), pad_cols(p["bo2"]).astype(f32),
    )
    return weights, H, Hp


def _vmem_capacity_bytes():
    try:
        return int(pltpu.get_tpu_info().vmem_capacity_bytes)
    except Exception:
        return 64 << 20   # conservative fallback (v7x per-TC VMEM)


def _choose_tile(N, per_row_bytes, fixed_bytes, vmem_budget, tm_request=None):
    """Pick a 16-aligned row tile that fits the VMEM budget; >=2 grid steps
    for non-trivial N so v7x's two TensorCores both get work."""
    n16 = _round_up(max(N, 1), SUBLANE_BF16)
    tm_max = max(
        ((vmem_budget - fixed_bytes) // max(per_row_bytes, 1))
        // SUBLANE_BF16 * SUBLANE_BF16,
        SUBLANE_BF16,
    )
    # NOTE: no feature/K-tiled fallback: if the resident weights alone exceed
    # the budget (very large hidden_dim on v7x), tm collapses to the minimum.
    tm = min(2048, tm_max, n16)
    if tm_request is not None:
        tm = max(min(_round_up(tm_request, SUBLANE_BF16), tm_max, n16),
                 SUBLANE_BF16)
    if n16 > 256 and _cdiv(n16, tm) < 2:       # feed both v7x TensorCores
        tm = max(_round_up(_cdiv(n16, 2), SUBLANE_BF16), SUBLANE_BF16)
    grid = _cdiv(n16, tm)
    return tm, grid * tm, grid


def adaptive_modality_processor_prepared(
    x, prepared, *, tm=None, compute_dtype=jnp.bfloat16, out_dtype=jnp.bfloat16
):
    """x: (batch, seq, input_dim) f32; prepared = prepare_weights(params)."""
    weights, H, Hp = prepared
    B, S, Din = x.shape
    N = B * S

    out_itemsize = jnp.dtype(out_dtype).itemsize
    weight_bytes = sum(
        w.size * w.dtype.itemsize for i, w in enumerate(weights) if i != B_HALT_IDX
    )

    # Per-row VMEM footprint: double-buffered x/out tiles + live activation
    # temporaries (~4 f32 + ~2 bf16 streams of width Hp).
    per_row = (
        2 * Din * jnp.dtype(compute_dtype).itemsize
        + 2 * Hp * out_itemsize
        + Hp * (4 * 4 + 2 * 2)
    )
    fixed = weight_bytes + (4 << 20)          # single-buffered weights + fudge

    vmem_physical = _vmem_capacity_bytes()
    vmem_budget = int(vmem_physical * 0.8)    # ~102 MiB v5e/v6e, ~51 MiB v7x

    tm_eff, N_pad, grid = _choose_tile(N, per_row, fixed, vmem_budget, tm_request=tm)

    vmem_est = fixed + per_row * tm_eff
    vmem_limit = int(min(max(2 * vmem_est, 32 << 20), vmem_budget))

    x2 = x.reshape(N, Din).astype(compute_dtype)
    if N_pad != N:
        x2 = jnp.pad(x2, ((0, N_pad - N), (0, 0)))

    def resident_spec(arr):
        # Whole (small) weight resident in VMEM with a constant index_map;
        # Buffered(1): the second pipeline buffer would be pure waste.
        return pl.BlockSpec(
            arr.shape, lambda i, nd=arr.ndim: (0,) * nd,
            pipeline_mode=pl.Buffered(1),
        )

    weight_specs = []
    for idx, w in enumerate(weights):
        if idx == B_HALT_IDX:
            weight_specs.append(pl.BlockSpec(memory_space=pltpu.MemorySpace.SMEM))
        else:
            weight_specs.append(resident_spec(w))

    in_specs = [pl.BlockSpec((tm_eff, Din), lambda i: (i, 0))] + weight_specs
    out_spec = pl.BlockSpec((tm_eff, Hp), lambda i: (i, 0))

    cost = pl.CostEstimate(
        flops=2 * N_pad * Hp * (Din + 9 * Hp),
        transcendentals=N_pad,
        bytes_accessed=N_pad * Din * 2 + N_pad * Hp * out_itemsize + weight_bytes,
    )

    out = pl.pallas_call(
        _amp_kernel,
        out_shape=jax.ShapeDtypeStruct((N_pad, Hp), out_dtype),
        grid_spec=pltpu.PrefetchScalarGridSpec(
            num_scalar_prefetch=0,
            grid=(grid,),
            in_specs=in_specs,
            out_specs=out_spec,
        ),
        compiler_params=pltpu.CompilerParams(
            dimension_semantics=("parallel",),
            vmem_limit_bytes=vmem_limit,
        ),
        cost_estimate=cost,
    )(x2, *weights)

    return out[:N, :H].astype(jnp.float32).reshape(B, S, H)


def adaptive_modality_processor(x, params, **kwargs):
    """Convenience path: pads/casts weights on every call. For repeated
    forwards, call prepare_weights() once and use the *_prepared variant."""
    prepared = prepare_weights(
        params, compute_dtype=kwargs.get("compute_dtype", jnp.bfloat16)
    )
    return adaptive_modality_processor_prepared(x, prepared, **kwargs)


# ---------------------------------------------------------------------------
# Parameters + pure-JAX reference
# ---------------------------------------------------------------------------
def init_params(key, input_dim, hidden_dim):
    """Deterministic synthetic parameters (biases as (1, D) rows), f32."""
    ks = jax.random.split(key, 16)
    s = 0.1

    def lin(k, din, dout):
        return s * jax.random.normal(k, (din, dout), jnp.float32)

    return {
        # AdaptiveComputation
        "w_in": lin(ks[0], input_dim, hidden_dim),
        "b_in": jnp.zeros((1, hidden_dim), jnp.float32),
        "w_halt": s * jax.random.normal(ks[1], (1, hidden_dim), jnp.float32),
        "b_halt": jnp.zeros((1, 1), jnp.float32),
        # MetaLearningModule
        "wm1": lin(ks[2], hidden_dim, hidden_dim),
        "bm1": jnp.zeros((1, hidden_dim), jnp.float32),
        "wm2": lin(ks[3], hidden_dim, hidden_dim),
        "bm2": jnp.zeros((1, hidden_dim), jnp.float32),
        # EvolutionaryLayer 0
        "we1a": lin(ks[4], hidden_dim, hidden_dim),
        "be1a": jnp.zeros((1, hidden_dim), jnp.float32),
        "we2a": lin(ks[5], hidden_dim, hidden_dim),
        "be2a": jnp.zeros((1, hidden_dim), jnp.float32),
        # EvolutionaryLayer 1
        "we1b": lin(ks[6], hidden_dim, hidden_dim),
        "be1b": jnp.zeros((1, hidden_dim), jnp.float32),
        "we2b": lin(ks[7], hidden_dim, hidden_dim),
        "be2b": jnp.zeros((1, hidden_dim), jnp.float32),
        # output head
        "wo1": lin(ks[8], hidden_dim, hidden_dim),
        "bo1": jnp.zeros((1, hidden_dim), jnp.float32),
        "wo2": lin(ks[9], hidden_dim, hidden_dim),
        "bo2": jnp.zeros((1, hidden_dim), jnp.float32),
    }


def _reference(x, p):
    """Pure-JAX f32 reference of the same forward (no padding, no bf16)."""
    B, S, Din = x.shape
    h = x.reshape(B * S, Din)
    h = jnp.maximum(h @ p["w_in"] + p["b_in"], 0.0)
    prob = jax.nn.sigmoid(jnp.sum(h * p["w_halt"], -1, keepdims=True) + p["b_halt"])
    h = h * prob
    h = jnp.maximum(h @ p["wm1"] + p["bm1"], 0.0) @ p["wm2"] + p["bm2"]
    h = h + (jnp.maximum(h @ p["we1a"] + p["be1a"], 0.0) @ p["we2a"] + p["be2a"])
    h = h + (jnp.maximum(h @ p["we1b"] + p["be1b"], 0.0) @ p["we2b"] + p["be2b"])
    h = jnp.maximum(h @ p["wo1"] + p["bo1"], 0.0) @ p["wo2"] + p["bo2"]
    return h.reshape(B, S, -1)


if __name__ == "__main__":
    batch, seq, input_dim, hidden_dim = 2, 8, 16, 32
    key = jax.random.PRNGKey(0)
    k_x, k_p = jax.random.split(key)
    x = jax.random.normal(k_x, (batch, seq, input_dim), jnp.float32)
    params = init_params(k_p, input_dim, hidden_dim)

    # Pad/cast weights once (hoisted out of the per-call hot path).
    prepared = prepare_weights(params)

    out = adaptive_modality_processor_prepared(x, prepared)
    out = jax.block_until_ready(out)

    ref = _reference(x, params)
    assert out.shape == (batch, seq, hidden_dim)
    # bf16 MXU operands / bf16-carried activations / bf16 output vs pure-f32
    # reference; f32 accumulation keeps the error well inside this tolerance
    # at this depth/width.
    assert jnp.allclose(out, ref, atol=2e-2, rtol=2e-2), float(
        jnp.max(jnp.abs(out - ref))
    )
    print("KERNEL_OK")
</pallas_src>

<mosaic_0001>
module attributes {stable_mosaic.version = 11 : i64} {
  func.func @_amp_kernel(%arg0: i32, %arg1: memref<16x16xbf16, #tpu.memory_space<vmem>>, %arg2: memref<16x128xbf16, #tpu.memory_space<vmem>>, %arg3: memref<1x128xf32, #tpu.memory_space<vmem>>, %arg4: memref<1x128xf32, #tpu.memory_space<vmem>>, %arg5: memref<1x1xf32, #tpu.memory_space<smem>>, %arg6: memref<128x128xbf16, #tpu.memory_space<vmem>>, %arg7: memref<1x128xf32, #tpu.memory_space<vmem>>, %arg8: memref<128x128xbf16, #tpu.memory_space<vmem>>, %arg9: memref<1x128xf32, #tpu.memory_space<vmem>>, %arg10: memref<128x128xbf16, #tpu.memory_space<vmem>>, %arg11: memref<1x128xf32, #tpu.memory_space<vmem>>, %arg12: memref<128x128xbf16, #tpu.memory_space<vmem>>, %arg13: memref<1x128xf32, #tpu.memory_space<vmem>>, %arg14: memref<128x128xbf16, #tpu.memory_space<vmem>>, %arg15: memref<1x128xf32, #tpu.memory_space<vmem>>, %arg16: memref<128x128xbf16, #tpu.memory_space<vmem>>, %arg17: memref<1x128xf32, #tpu.memory_space<vmem>>, %arg18: memref<128x128xbf16, #tpu.memory_space<vmem>>, %arg19: memref<1x128xf32, #tpu.memory_space<vmem>>, %arg20: memref<128x128xbf16, #tpu.memory_space<vmem>>, %arg21: memref<1x128xf32, #tpu.memory_space<vmem>>, %arg22: memref<16x128xbf16, #tpu.memory_space<vmem>>) attributes {dimension_semantics = [#tpu.dimension_semantics<parallel>], iteration_bounds = array<i64: 1>, scalar_prefetch = 0 : i64, scratch_operands = 0 : i64, tpu.core_type = #tpu.core_type<tc>, window_params = [{transform_indices = @transform_0, window_bounds = array<i64: 16, 16>}, {pipeline_mode = #tpu.pipeline_mode<synchronous>, transform_indices = @transform_1, window_bounds = array<i64: 16, 128>}, {pipeline_mode = #tpu.pipeline_mode<synchronous>, transform_indices = @transform_2, window_bounds = array<i64: 1, 128>}, {pipeline_mode = #tpu.pipeline_mode<synchronous>, transform_indices = @transform_3, window_bounds = array<i64: 1, 128>}, {transform_indices = @transform_4, window_bounds = array<i64: 1, 1>}, {pipeline_mode = #tpu.pipeline_mode<synchronous>, transform_indices = @transform_5, window_bounds = array<i64: 128, 128>}, {pipeline_mode = #tpu.pipeline_mode<synchronous>, transform_indices = @transform_6, window_bounds = array<i64: 1, 128>}, {pipeline_mode = #tpu.pipeline_mode<synchronous>, transform_indices = @transform_7, window_bounds = array<i64: 128, 128>}, {pipeline_mode = #tpu.pipeline_mode<synchronous>, transform_indices = @transform_8, window_bounds = array<i64: 1, 128>}, {pipeline_mode = #tpu.pipeline_mode<synchronous>, transform_indices = @transform_9, window_bounds = array<i64: 128, 128>}, {pipeline_mode = #tpu.pipeline_mode<synchronous>, transform_indices = @transform_10, window_bounds = array<i64: 1, 128>}, {pipeline_mode = #tpu.pipeline_mode<synchronous>, transform_indices = @transform_11, window_bounds = array<i64: 128, 128>}, {pipeline_mode = #tpu.pipeline_mode<synchronous>, transform_indices = @transform_12, window_bounds = array<i64: 1, 128>}, {pipeline_mode = #tpu.pipeline_mode<synchronous>, transform_indices = @transform_13, window_bounds = array<i64: 128, 128>}, {pipeline_mode = #tpu.pipeline_mode<synchronous>, transform_indices = @transform_14, window_bounds = array<i64: 1, 128>}, {pipeline_mode = #tpu.pipeline_mode<synchronous>, transform_indices = @transform_15, window_bounds = array<i64: 128, 128>}, {pipeline_mode = #tpu.pipeline_mode<synchronous>, transform_indices = @transform_16, window_bounds = array<i64: 1, 128>}, {pipeline_mode = #tpu.pipeline_mode<synchronous>, transform_indices = @transform_17, window_bounds = array<i64: 128, 128>}, {pipeline_mode = #tpu.pipeline_mode<synchronous>, transform_indices = @transform_18, window_bounds = array<i64: 1, 128>}, {pipeline_mode = #tpu.pipeline_mode<synchronous>, transform_indices = @transform_19, window_bounds = array<i64: 128, 128>}, {pipeline_mode = #tpu.pipeline_mode<synchronous>, transform_indices = @transform_20, window_bounds = array<i64: 1, 128>}, {transform_indices = @transform_21, window_bounds = array<i64: 16, 128>}]} {
    %c0 = arith.constant 0 : index
    %c0_0 = arith.constant 0 : index
    %0 = vector.load %arg1[%c0, %c0_0] : memref<16x16xbf16, #tpu.memory_space<vmem>>, vector<16x16xbf16>
    %c0_1 = arith.constant 0 : index
    %c0_2 = arith.constant 0 : index
    %1 = vector.load %arg2[%c0_1, %c0_2] : memref<16x128xbf16, #tpu.memory_space<vmem>>, vector<16x128xbf16>
    %cst = arith.constant dense<0.000000e+00> : vector<16x128xf32>
    %2 = tpu.matmul %0, %1, %cst {dimension_numbers = #tpu.dot_dimension_numbers<[1], [0], [0], [1], [0, 0, 1, 1], [], []>} : vector<16x16xbf16>, vector<16x128xbf16>, vector<16x128xf32> -> vector<16x128xf32>
    %c0_3 = arith.constant 0 : index
    %c0_4 = arith.constant 0 : index
    %3 = vector.load %arg3[%c0_3, %c0_4] : memref<1x128xf32, #tpu.memory_space<vmem>>, vector<1x128xf32>
    %4 = vector.broadcast %3 : vector<1x128xf32> to vector<16x128xf32>
    %5 = arith.addf %2, %4 : vector<16x128xf32>
    %cst_5 = arith.constant 0.000000e+00 : f32
    %6 = vector.broadcast %cst_5 : f32 to vector<16x128xf32>
    %7 = arith.maximumf %5, %6 : vector<16x128xf32>
    %c0_6 = arith.constant 0 : index
    %c0_7 = arith.constant 0 : index
    %8 = vector.load %arg4[%c0_6, %c0_7] : memref<1x128xf32, #tpu.memory_space<vmem>>, vector<1x128xf32>
    %9 = vector.broadcast %8 : vector<1x128xf32> to vector<16x128xf32>
    %10 = arith.mulf %7, %9 : vector<16x128xf32>
    %cst_8 = arith.constant dense<0.000000e+00> : vector<16xf32>
    %11 = vector.multi_reduction <add>, %10, %cst_8 [1] : vector<16x128xf32> to vector<16xf32>
    %12 = vector.shape_cast %11 : vector<16xf32> to vector<16x1xf32>
    %c0_9 = arith.constant 0 : index
    %c0_10 = arith.constant 0 : index
    %13 = memref.load %arg5[%c0_9, %c0_10] : memref<1x1xf32, #tpu.memory_space<smem>>
    %14 = vector.broadcast %13 : f32 to vector<16x1xf32>
    %15 = arith.addf %12, %14 : vector<16x1xf32>
    %16 = arith.negf %15 : vector<16x1xf32>
    %17 = math.exp %16 : vector<16x1xf32>
    %cst_11 = arith.constant 1.000000e+00 : f32
    %18 = vector.broadcast %cst_11 : f32 to vector<16x1xf32>
    %19 = arith.addf %18, %17 : vector<16x1xf32>
    %20 = arith.divf %18, %19 : vector<16x1xf32>
    %21 = vector.broadcast %20 : vector<16x1xf32> to vector<16x128xf32>
    %22 = arith.mulf %7, %21 : vector<16x128xf32>
    %23 = arith.truncf %22 : vector<16x128xf32> to vector<16x128xbf16>
    %c0_12 = arith.constant 0 : index
    %c0_13 = arith.constant 0 : index
    %24 = vector.load %arg6[%c0_12, %c0_13] : memref<128x128xbf16, #tpu.memory_space<vmem>>, vector<128x128xbf16>
    %cst_14 = arith.constant dense<0.000000e+00> : vector<16x128xf32>
    %25 = tpu.matmul %23, %24, %cst_14 {dimension_numbers = #tpu.dot_dimension_numbers<[1], [0], [0], [1], [0, 0, 1, 1], [], []>} : vector<16x128xbf16>, vector<128x128xbf16>, vector<16x128xf32> -> vector<16x128xf32>
    %c0_15 = arith.constant 0 : index
    %c0_16 = arith.constant 0 : index
    %26 = vector.load %arg7[%c0_15, %c0_16] : memref<1x128xf32, #tpu.memory_space<vmem>>, vector<1x128xf32>
    %27 = vector.broadcast %26 : vector<1x128xf32> to vector<16x128xf32>
    %28 = arith.addf %25, %27 : vector<16x128xf32>
    %cst_17 = arith.constant 0.000000e+00 : f32
    %29 = vector.broadcast %cst_17 : f32 to vector<16x128xf32>
    %30 = arith.maximumf %28, %29 : vector<16x128xf32>
    %31 = arith.truncf %30 : vector<16x128xf32> to vector<16x128xbf16>
    %c0_18 = arith.constant 0 : index
    %c0_19 = arith.constant 0 : index
    %32 = vector.load %arg8[%c0_18, %c0_19] : memref<128x128xbf16, #tpu.memory_space<vmem>>, vector<128x128xbf16>
    %cst_20 = arith.constant dense<0.000000e+00> : vector<16x128xf32>
    %33 = tpu.matmul %31, %32, %cst_20 {dimension_numbers = #tpu.dot_dimension_numbers<[1], [0], [0], [1], [0, 0, 1, 1], [], []>} : vector<16x128xbf16>, vector<128x128xbf16>, vector<16x128xf32> -> vector<16x128xf32>
    %c0_21 = arith.constant 0 : index
    %c0_22 = arith.constant 0 : index
    %34 = vector.load %arg9[%c0_21, %c0_22] : memref<1x128xf32, #tpu.memory_space<vmem>>, vector<1x128xf32>
    %35 = vector.broadcast %34 : vector<1x128xf32> to vector<16x128xf32>
    %36 = arith.addf %33, %35 : vector<16x128xf32>
    %37 = arith.truncf %36 : vector<16x128xf32> to vector<16x128xbf16>
    %c0_23 = arith.constant 0 : index
    %c0_24 = arith.constant 0 : index
    %38 = vector.load %arg10[%c0_23, %c0_24] : memref<128x128xbf16, #tpu.memory_space<vmem>>, vector<128x128xbf16>
    %cst_25 = arith.constant dense<0.000000e+00> : vector<16x128xf32>
    %39 = tpu.matmul %37, %38, %cst_25 {dimension_numbers = #tpu.dot_dimension_numbers<[1], [0], [0], [1], [0, 0, 1, 1], [], []>} : vector<16x128xbf16>, vector<128x128xbf16>, vector<16x128xf32> -> vector<16x128xf32>
    %c0_26 = arith.constant 0 : index
    %c0_27 = arith.constant 0 : index
    %40 = vector.load %arg11[%c0_26, %c0_27] : memref<1x128xf32, #tpu.memory_space<vmem>>, vector<1x128xf32>
    %41 = vector.broadcast %40 : vector<1x128xf32> to vector<16x128xf32>
    %42 = arith.addf %39, %41 : vector<16x128xf32>
    %cst_28 = arith.constant 0.000000e+00 : f32
    %43 = vector.broadcast %cst_28 : f32 to vector<16x128xf32>
    %44 = arith.maximumf %42, %43 : vector<16x128xf32>
    %45 = arith.truncf %44 : vector<16x128xf32> to vector<16x128xbf16>
    %c0_29 = arith.constant 0 : index
    %c0_30 = arith.constant 0 : index
    %46 = vector.load %arg12[%c0_29, %c0_30] : memref<128x128xbf16, #tpu.memory_space<vmem>>, vector<128x128xbf16>
    %cst_31 = arith.constant dense<0.000000e+00> : vector<16x128xf32>
    %47 = tpu.matmul %45, %46, %cst_31 {dimension_numbers = #tpu.dot_dimension_numbers<[1], [0], [0], [1], [0, 0, 1, 1], [], []>} : vector<16x128xbf16>, vector<128x128xbf16>, vector<16x128xf32> -> vector<16x128xf32>
    %c0_32 = arith.constant 0 : index
    %c0_33 = arith.constant 0 : index
    %48 = vector.load %arg13[%c0_32, %c0_33] : memref<1x128xf32, #tpu.memory_space<vmem>>, vector<1x128xf32>
    %49 = vector.broadcast %48 : vector<1x128xf32> to vector<16x128xf32>
    %50 = arith.addf %47, %49 : vector<16x128xf32>
    %51 = arith.addf %36, %50 : vector<16x128xf32>
    %52 = arith.truncf %51 : vector<16x128xf32> to vector<16x128xbf16>
    %c0_34 = arith.constant 0 : index
    %c0_35 = arith.constant 0 : index
    %53 = vector.load %arg14[%c0_34, %c0_35] : memref<128x128xbf16, #tpu.memory_space<vmem>>, vector<128x128xbf16>
    %cst_36 = arith.constant dense<0.000000e+00> : vector<16x128xf32>
    %54 = tpu.matmul %52, %53, %cst_36 {dimension_numbers = #tpu.dot_dimension_numbers<[1], [0], [0], [1], [0, 0, 1, 1], [], []>} : vector<16x128xbf16>, vector<128x128xbf16>, vector<16x128xf32> -> vector<16x128xf32>
    %c0_37 = arith.constant 0 : index
    %c0_38 = arith.constant 0 : index
    %55 = vector.load %arg15[%c0_37, %c0_38] : memref<1x128xf32, #tpu.memory_space<vmem>>, vector<1x128xf32>
    %56 = vector.broadcast %55 : vector<1x128xf32> to vector<16x128xf32>
    %57 = arith.addf %54, %56 : vector<16x128xf32>
    %cst_39 = arith.constant 0.000000e+00 : f32
    %58 = vector.broadcast %cst_39 : f32 to vector<16x128xf32>
    %59 = arith.maximumf %57, %58 : vector<16x128xf32>
    %60 = arith.truncf %59 : vector<16x128xf32> to vector<16x128xbf16>
    %c0_40 = arith.constant 0 : index
    %c0_41 = arith.constant 0 : index
    %61 = vector.load %arg16[%c0_40, %c0_41] : memref<128x128xbf16, #tpu.memory_space<vmem>>, vector<128x128xbf16>
    %cst_42 = arith.constant dense<0.000000e+00> : vector<16x128xf32>
    %62 = tpu.matmul %60, %61, %cst_42 {dimension_numbers = #tpu.dot_dimension_numbers<[1], [0], [0], [1], [0, 0, 1, 1], [], []>} : vector<16x128xbf16>, vector<128x128xbf16>, vector<16x128xf32> -> vector<16x128xf32>
    %c0_43 = arith.constant 0 : index
    %c0_44 = arith.constant 0 : index
    %63 = vector.load %arg17[%c0_43, %c0_44] : memref<1x128xf32, #tpu.memory_space<vmem>>, vector<1x128xf32>
    %64 = vector.broadcast %63 : vector<1x128xf32> to vector<16x128xf32>
    %65 = arith.addf %62, %64 : vector<16x128xf32>
    %66 = arith.addf %51, %65 : vector<16x128xf32>
    %67 = arith.truncf %66 : vector<16x128xf32> to vector<16x128xbf16>
    %c0_45 = arith.constant 0 : index
    %c0_46 = arith.constant 0 : index
    %68 = vector.load %arg18[%c0_45, %c0_46] : memref<128x128xbf16, #tpu.memory_space<vmem>>, vector<128x128xbf16>
    %cst_47 = arith.constant dense<0.000000e+00> : vector<16x128xf32>
    %69 = tpu.matmul %67, %68, %cst_47 {dimension_numbers = #tpu.dot_dimension_numbers<[1], [0], [0], [1], [0, 0, 1, 1], [], []>} : vector<16x128xbf16>, vector<128x128xbf16>, vector<16x128xf32> -> vector<16x128xf32>
    %c0_48 = arith.constant 0 : index
    %c0_49 = arith.constant 0 : index
    %70 = vector.load %arg19[%c0_48, %c0_49] : memref<1x128xf32, #tpu.memory_space<vmem>>, vector<1x128xf32>
    %71 = vector.broadcast %70 : vector<1x128xf32> to vector<16x128xf32>
    %72 = arith.addf %69, %71 : vector<16x128xf32>
    %cst_50 = arith.constant 0.000000e+00 : f32
    %73 = vector.broadcast %cst_50 : f32 to vector<16x128xf32>
    %74 = arith.maximumf %72, %73 : vector<16x128xf32>
    %75 = arith.truncf %74 : vector<16x128xf32> to vector<16x128xbf16>
    %c0_51 = arith.constant 0 : index
    %c0_52 = arith.constant 0 : index
    %76 = vector.load %arg20[%c0_51, %c0_52] : memref<128x128xbf16, #tpu.memory_space<vmem>>, vector<128x128xbf16>
    %cst_53 = arith.constant dense<0.000000e+00> : vector<16x128xf32>
    %77 = tpu.matmul %75, %76, %cst_53 {dimension_numbers = #tpu.dot_dimension_numbers<[1], [0], [0], [1], [0, 0, 1, 1], [], []>} : vector<16x128xbf16>, vector<128x128xbf16>, vector<16x128xf32> -> vector<16x128xf32>
    %c0_54 = arith.constant 0 : index
    %c0_55 = arith.constant 0 : index
    %78 = vector.load %arg21[%c0_54, %c0_55] : memref<1x128xf32, #tpu.memory_space<vmem>>, vector<1x128xf32>
    %79 = vector.broadcast %78 : vector<1x128xf32> to vector<16x128xf32>
    %80 = arith.addf %77, %79 : vector<16x128xf32>
    %81 = arith.truncf %80 : vector<16x128xf32> to vector<16x128xbf16>
    %c0_56 = arith.constant 0 : index
    %c0_57 = arith.constant 0 : index
    %82 = vector.load %arg22[%c0_56, %c0_57] : memref<16x128xbf16, #tpu.memory_space<vmem>>, vector<16x128xbf16>
    tpu.vector_store %arg22[%c0_56, %c0_57], %81 {strides = array<i32>} : memref<16x128xbf16, #tpu.memory_space<vmem>>, vector<16x128xbf16>,
    return
  }
  func.func @transform_0(%arg0: i32) -> (i32, i32) {
    %c0_i32 = arith.constant 0 : i32
    %c0_i32_0 = arith.constant 0 : i32
    return %arg0, %c0_i32 : i32, i32
  }
  func.func @transform_1(%arg0: i32) -> (i32, i32) {
    %c0_i32 = arith.constant 0 : i32
    %c0_i32_0 = arith.constant 0 : i32
    %c0_i32_1 = arith.constant 0 : i32
    return %c0_i32, %c0_i32_0 : i32, i32
  }
  func.func @transform_2(%arg0: i32) -> (i32, i32) {
    %c0_i32 = arith.constant 0 : i32
    %c0_i32_0 = arith.constant 0 : i32
    %c0_i32_1 = arith.constant 0 : i32
    return %c0_i32, %c0_i32_0 : i32, i32
  }
  func.func @transform_3(%arg0: i32) -> (i32, i32) {
    %c0_i32 = arith.constant 0 : i32
    %c0_i32_0 = arith.constant 0 : i32
    %c0_i32_1 = arith.constant 0 : i32
    return %c0_i32, %c0_i32_0 : i32, i32
  }
  func.func @transform_4(%arg0: i32) -> (i32, i32) {
    %c0_i32 = arith.constant 0 : i32
    %c0_i32_0 = arith.constant 0 : i32
    %c0_i32_1 = arith.constant 0 : i32
    return %c0_i32, %c0_i32_0 : i32, i32
  }
  func.func @transform_5(%arg0: i32) -> (i32, i32) {
    %c0_i32 = arith.constant 0 : i32
    %c0_i32_0 = arith.constant 0 : i32
    %c0_i32_1 = arith.constant 0 : i32
    return %c0_i32, %c0_i32_0 : i32, i32
  }
  func.func @transform_6(%arg0: i32) -> (i32, i32) {
    %c0_i32 = arith.constant 0 : i32
    %c0_i32_0 = arith.constant 0 : i32
    %c0_i32_1 = arith.constant 0 : i32
    return %c0_i32, %c0_i32_0 : i32, i32
  }
  func.func @transform_7(%arg0: i32) -> (i32, i32) {
    %c0_i32 = arith.constant 0 : i32
    %c0_i32_0 = arith.constant 0 : i32
    %c0_i32_1 = arith.constant 0 : i32
    return %c0_i32, %c0_i32_0 : i32, i32
  }
  func.func @transform_8(%arg0: i32) -> (i32, i32) {
    %c0_i32 = arith.constant 0 : i32
    %c0_i32_0 = arith.constant 0 : i32
    %c0_i32_1 = arith.constant 0 : i32
    return %c0_i32, %c0_i32_0 : i32, i32
  }
  func.func @transform_9(%arg0: i32) -> (i32, i32) {
    %c0_i32 = arith.constant 0 : i32
    %c0_i32_0 = arith.constant 0 : i32
    %c0_i32_1 = arith.constant 0 : i32
    return %c0_i32, %c0_i32_0 : i32, i32
  }
  func.func @transform_10(%arg0: i32) -> (i32, i32) {
    %c0_i32 = arith.constant 0 : i32
    %c0_i32_0 = arith.constant 0 : i32
    %c0_i32_1 = arith.constant 0 : i32
    return %c0_i32, %c0_i32_0 : i32, i32
  }
  func.func @transform_11(%arg0: i32) -> (i32, i32) {
    %c0_i32 = arith.constant 0 : i32
    %c0_i32_0 = arith.constant 0 : i32
    %c0_i32_1 = arith.constant 0 : i32
    return %c0_i32, %c0_i32_0 : i32, i32
  }
  func.func @transform_12(%arg0: i32) -> (i32, i32) {
    %c0_i32 = arith.constant 0 : i32
    %c0_i32_0 = arith.constant 0 : i32
    %c0_i32_1 = arith.constant 0 : i32
    return %c0_i32, %c0_i32_0 : i32, i32
  }
  func.func @transform_13(%arg0: i32) -> (i32, i32) {
    %c0_i32 = arith.constant 0 : i32
    %c0_i32_0 = arith.constant 0 : i32
    %c0_i32_1 = arith.constant 0 : i32
    return %c0_i32, %c0_i32_0 : i32, i32
  }
  func.func @transform_14(%arg0: i32) -> (i32, i32) {
    %c0_i32 = arith.constant 0 : i32
    %c0_i32_0 = arith.constant 0 : i32
    %c0_i32_1 = arith.constant 0 : i32
    return %c0_i32, %c0_i32_0 : i32, i32
  }
  func.func @transform_15(%arg0: i32) -> (i32, i32) {
    %c0_i32 = arith.constant 0 : i32
    %c0_i32_0 = arith.constant 0 : i32
    %c0_i32_1 = arith.constant 0 : i32
    return %c0_i32, %c0_i32_0 : i32, i32
  }
  func.func @transform_16(%arg0: i32) -> (i32, i32) {
    %c0_i32 = arith.constant 0 : i32
    %c0_i32_0 = arith.constant 0 : i32
    %c0_i32_1 = arith.constant 0 : i32
    return %c0_i32, %c0_i32_0 : i32, i32
  }
  func.func @transform_17(%arg0: i32) -> (i32, i32) {
    %c0_i32 = arith.constant 0 : i32
    %c0_i32_0 = arith.constant 0 : i32
    %c0_i32_1 = arith.constant 0 : i32
    return %c0_i32, %c0_i32_0 : i32, i32
  }
  func.func @transform_18(%arg0: i32) -> (i32, i32) {
    %c0_i32 = arith.constant 0 : i32
    %c0_i32_0 = arith.constant 0 : i32
    %c0_i32_1 = arith.constant 0 : i32
    return %c0_i32, %c0_i32_0 : i32, i32
  }
  func.func @transform_19(%arg0: i32) -> (i32, i32) {
    %c0_i32 = arith.constant 0 : i32
    %c0_i32_0 = arith.constant 0 : i32
    %c0_i32_1 = arith.constant 0 : i32
    return %c0_i32, %c0_i32_0 : i32, i32
  }
  func.func @transform_20(%arg0: i32) -> (i32, i32) {
    %c0_i32 = arith.constant 0 : i32
    %c0_i32_0 = arith.constant 0 : i32
    %c0_i32_1 = arith.constant 0 : i32
    return %c0_i32, %c0_i32_0 : i32, i32
  }
  func.func @transform_21(%arg0: i32) -> (i32, i32) {
    %c0_i32 = arith.constant 0 : i32
    %c0_i32_0 = arith.constant 0 : i32
    return %arg0, %c0_i32 : i32, i32
  }
}

</mosaic_0001>

<bundles_post_ra>
// kernel: tpu_custom_call.1
= control target key start
LH: loop header
LB: loop body
LE: loop exit
PB: predicated region body
PF: predicated region fallthrough
CT: control target
= control target key end

     0   :  { %s2729_s0 = inlined_call_operand.hbm [shape: bf16[16,16], index: 0, kind: input, shape index: {}]   ;;  %s2730_s1 = inlined_call_operand.hbm [shape: bf16[16,128], index: 1, kind: input, shape index: {}]   ;;  %s2731_s2 = inlined_call_operand.hbm [shape: f32[1,128], index: 2, kind: input, shape index: {}]   ;;  %s2732_s3 = inlined_call_operand.hbm [shape: f32[1,128], index: 3, kind: input, shape index: {}]   ;;  %s2733_s4 = inlined_call_operand.<no memory space> [shape: f32[1,1], index: 4, kind: input, shape index: {}]   ;;  %s2734_s5 = inlined_call_operand.hbm [shape: bf16[128,128], index: 5, kind: input, shape index: {}]   ;;  %s2735_s6 = inlined_call_operand.hbm [shape: f32[1,128], index: 6, kind: input, shape index: {}]   ;;  %s2736_s7 = inlined_call_operand.hbm [shape: bf16[128,128], index: 7, kind: input, shape index: {}]   ;;  %s2737_s8 = inlined_call_operand.hbm [shape: f32[1,128], index: 8, kind: input, shape index: {}]   ;;  %s2738_s9 = inlined_call_operand.hbm [shape: bf16[128,128], index: 9, kind: input, shape index: {}]   ;;  %s2739_s10 = inlined_call_operand.hbm [shape: f32[1,128], index: 10, kind: input, shape index: {}]   ;;  %s2740_s11 = inlined_call_operand.hbm [shape: bf16[128,128], index: 11, kind: input, shape index: {}]   ;;  %s2741_s12 = inlined_call_operand.hbm [shape: f32[1,128], index: 12, kind: input, shape index: {}]   ;;  %s2742_s13 = inlined_call_operand.hbm [shape: bf16[128,128], index: 13, kind: input, shape index: {}]   ;;  %s2743_s14 = inlined_call_operand.hbm [shape: f32[1,128], index: 14, kind: input, shape index: {}]   ;;  %s2744_s15 = inlined_call_operand.hbm [shape: bf16[128,128], index: 15, kind: input, shape index: {}]   ;;  %s2745_s16 = inlined_call_operand.hbm [shape: f32[1,128], index: 16, kind: input, shape index: {}]   ;;  %s2746_s17 = inlined_call_operand.vmem [shape: bf16[128,128], index: 17, kind: input, shape index: {}]   ;;  %s2747_s18 = inlined_call_operand.vmem [shape: f32[1,128], index: 18, kind: input, shape index: {}]   ;;  %s2748_s19 = inlined_call_operand.hbm [shape: bf16[128,128], index: 19, kind: input, shape index: {}]   ;;  %s2749_s20 = inlined_call_operand.vmem [shape: f32[1,128], index: 20, kind: input, shape index: {}]   ;;  %s2750_s21 = inlined_call_operand.hbm [shape: bf16[16,128], index: 21, kind: output, shape index: {}]  }
   0x1   :  { %2760 = sst [smem:[#allocation41_spill]] %s2729_s0 }
   0x2   :  { %2761 = sst [smem:[#allocation42_spill]] %s2730_s1 }
   0x3   :  { %2762 = sst [smem:[#allocation43_spill]] %s2731_s2 }
   0x4   :  { %2763 = sst [smem:[#allocation44_spill]] %s2732_s3 }
   0x5   :  { %2764 = sst [smem:[#allocation45_spill]] %s2733_s4 }
   0x6   :  { %2765 = sst [smem:[#allocation46_spill]] %s2734_s5 }
   0x7   :  { %27 = vsyncpa [#allocation4], 0 }
   0x8   :  { %28 = vsyncpa [#allocation7], 0 }
   0x9   :  { %29 = vsyncpa [#allocation10], 0 }
   0xa   :  { %30 = vsyncpa [#allocation13], 0 }
   0xb   :  { %31 = vsyncpa [#allocation16], 0 }
   0xc   :  { %32 = vsyncpa [#allocation19], 0 }
   0xd   :  { %33 = vsyncpa [#allocation22], 0 }
   0xe   :  { %34 = vsyncpa [#allocation25], 0 }
   0xf   :  { %35 = vsyncpa [#allocation28], 0 }
  0x10   :  { %36 = vsyncpa [#allocation5], 0  ;;  %s2176_s2 = smov [#allocation6]   ;;  %s2177_s26 = smov [#allocation9]  }
  0x11   :  { %s54_s25 = sshll.u32 %s2176_s2, 4  ;;  %s77_s27 = sshll.u32 %s2177_s26, 4  ;;  %s55_s25 = int_to_ptr.vmem [resolvable:$true] %s54_s25  ;;  %s2308_s27 = int_to_ptr.vmem [resolvable:$true] %s77_s27 }
  0x12   :  { %s2766_s29 = sld [smem:[#allocation42_spill]] }
  0x18   :  { %s1760_s0 = scalar_lea.hbm %s2766_s29, 128 }
  0x19   :  { %p1761_p0 = scmp.ne.s32.totalorder %s2766_s29, %s1760_s0  ;;  %p1764_p1 = scmp.lt.u32.totalorder %s1760_s0, %s2766_s29 }
  0x1b   :  { %p1766_p2 = pnand %p1764_p1, %p1761_p0 }
  0x1d   :  { %1769 = shalt.err (!%p1766_p2)
}
  0x1e   :  { %s1770_s23 = scalar_lea.vmem %s55_s25, 128  ;;  %p1775_p4 = scmp.lt.s32.totalorder %s55_s25, %s55_s25 }
  0x1f   :  { %p1771_p3 = scmp.ne.s32.totalorder %s55_s25, %s1770_s23  ;;  %p1776_p5 = scmp.lt.s32.totalorder %s1770_s23, %s1770_s23 }
  0x21   :  { %p1777_p6 = por %p1776_p5, %p1775_p4 }
  0x23   :  { %p1778_p7 = pnand %p1777_p6, %p1771_p3 }
  0x25   :  { %1781 = shalt.err (!%p1778_p7)
}
  0x26   :  { %s2756_s1 = smov 64   ;;  %s2758_s24 = smov 4  }
  0x27   :  { %60 = dma.hbm_to_vmem [thread:$0]  %s2766_s29, 128, %s55_s25, [#allocation7], %s2756_s1, %s2756_s1, %s2758_s24  }
  0x28   :  { %s2767_s0 = sld [smem:[#allocation44_spill]] }
  0x2e   :  { %s1782_s4 = scalar_lea.hbm %s2767_s0, 16 }
  0x2f   :  { %p1783_p8 = scmp.ne.s32.totalorder %s2767_s0, %s1782_s4  ;;  %p1786_p9 = scmp.lt.u32.totalorder %s1782_s4, %s2767_s0 }
  0x31   :  { %p1788_p10 = pnand %p1786_p9, %p1783_p8 }
  0x33   :  { %1791 = shalt.err (!%p1788_p10)
}
  0x34   :  { %s1792_s2 = scalar_lea.vmem %s2308_s27, 16  ;;  %s1796_s25 = scalar_lea.vmem %s2308_s27, 32 }
  0x35   :  { %p1793_p11 = scmp.ne.s32.totalorder %s2308_s27, %s1792_s2  ;;  %p1797_p12 = scmp.lt.s32.totalorder %s2308_s27, %s2308_s27 }
  0x36   :  { %p1798_p13 = scmp.lt.s32.totalorder %s1796_s25, %s1792_s2 }
  0x38   :  { %p1799_p0 = por %p1798_p13, %p1797_p12 }
  0x3a   :  { %p1800_p1 = pnand %p1799_p0, %p1793_p11 }
  0x3c   :  { %1803 = shalt.err (!%p1800_p1)
}
  0x3d   :  { %80 = dma.hbm_to_vmem [thread:$0]  %s2767_s0, 16, %s2308_s27, [#allocation10]  }
  0x3e   :  { %s2180_s3 = smov [#allocation12]   ;;  %s2181_s4 = smov [#allocation15]  }
  0x3f   :  { %s101_s28 = sshll.u32 %s2180_s3, 4  ;;  %s123_s30 = sshll.u32 %s2181_s4, 4  ;;  %s102_s28 = int_to_ptr.vmem [resolvable:$true] %s101_s28  ;;  %s124_s30 = int_to_ptr.vmem [resolvable:$true] %s123_s30 }
  0x40   :  { %s1804_s23 = scalar_lea.hbm %s2735_s6, 16 }
  0x41   :  { %p1805_p2 = scmp.ne.s32.totalorder %s2735_s6, %s1804_s23  ;;  %p1808_p3 = scmp.lt.u32.totalorder %s1804_s23, %s2735_s6 }
  0x43   :  { %p1810_p4 = pnand %p1808_p3, %p1805_p2 }
  0x45   :  { %1813 = shalt.err (!%p1810_p4)
}
  0x46   :  { %s1814_s27 = scalar_lea.vmem %s102_s28, 16  ;;  %s1818_s0 = scalar_lea.vmem %s102_s28, 32 }
  0x47   :  { %p1815_p5 = scmp.ne.s32.totalorder %s102_s28, %s1814_s27  ;;  %p1819_p6 = scmp.lt.s32.totalorder %s102_s28, %s102_s28 }
  0x48   :  { %p1820_p7 = scmp.lt.s32.totalorder %s1818_s0, %s1814_s27 }
  0x4a   :  { %p1821_p8 = por %p1820_p7, %p1819_p6 }
  0x4c   :  { %p1822_p9 = pnand %p1821_p8, %p1815_p5 }
  0x4e   :  { %1825 = shalt.err (!%p1822_p9)
}
  0x4f   :  { %104 = dma.hbm_to_vmem [thread:$0]  %s2735_s6, 16, %s102_s28, [#allocation13]  }
  0x50   :  { %s1826_s4 = scalar_lea.hbm %s2737_s8, 16 }
  0x51   :  { %p1827_p10 = scmp.ne.s32.totalorder %s2737_s8, %s1826_s4  ;;  %p1830_p11 = scmp.lt.u32.totalorder %s1826_s4, %s2737_s8 }
  0x53   :  { %p1832_p12 = pnand %p1830_p11, %p1827_p10 }
  0x55   :  { %1835 = shalt.err (!%p1832_p12)
}
  0x56   :  { %s1836_s2 = scalar_lea.vmem %s124_s30, 16  ;;  %s1840_s25 = scalar_lea.vmem %s124_s30, 32 }
  0x57   :  { %p1837_p13 = scmp.ne.s32.totalorder %s124_s30, %s1836_s2  ;;  %p1841_p0 = scmp.lt.s32.totalorder %s124_s30, %s124_s30 }
  0x58   :  { %p1842_p1 = scmp.lt.s32.totalorder %s1840_s25, %s1836_s2 }
  0x5a   :  { %p1843_p2 = por %p1842_p1, %p1841_p0 }
  0x5c   :  { %p1844_p3 = pnand %p1843_p2, %p1837_p13 }
  0x5e   :  { %1847 = shalt.err (!%p1844_p3)
}
  0x5f   :  { %126 = dma.hbm_to_vmem [thread:$0]  %s2737_s8, 16, %s124_s30, [#allocation16]  }
  0x60   :  { %s2182_s27 = smov [#allocation18]   ;;  %s2183_s29 = smov [#allocation21]  }
  0x61   :  { %s145_s0 = sshll.u32 %s2182_s27, 4  ;;  %s167_s26 = sshll.u32 %s2183_s29, 4  ;;  %s146_s0 = int_to_ptr.vmem [resolvable:$true] %s145_s0  ;;  %s168_s26 = int_to_ptr.vmem [resolvable:$true] %s167_s26 }
  0x62   :  { %s1848_s4 = scalar_lea.hbm %s2739_s10, 16 }
  0x63   :  { %p1849_p4 = scmp.ne.s32.totalorder %s2739_s10, %s1848_s4  ;;  %p1852_p5 = scmp.lt.u32.totalorder %s1848_s4, %s2739_s10 }
  0x65   :  { %p1854_p6 = pnand %p1852_p5, %p1849_p4 }
  0x67   :  { %1857 = shalt.err (!%p1854_p6)
}
  0x68   :  { %s1858_s8 = scalar_lea.vmem %s146_s0, 16  ;;  %s1862_s30 = scalar_lea.vmem %s146_s0, 32 }
  0x69   :  { %p1859_p7 = scmp.ne.s32.totalorder %s146_s0, %s1858_s8  ;;  %p1863_p8 = scmp.lt.s32.totalorder %s146_s0, %s146_s0 }
  0x6a   :  { %p1864_p9 = scmp.lt.s32.totalorder %s1862_s30, %s1858_s8 }
  0x6c   :  { %p1865_p10 = por %p1864_p9, %p1863_p8 }
  0x6e   :  { %p1866_p11 = pnand %p1865_p10, %p1859_p7 }
  0x70   :  { %1869 = shalt.err (!%p1866_p11)
}
  0x71   :  { %148 = dma.hbm_to_vmem [thread:$0]  %s2739_s10, 16, %s146_s0, [#allocation19]  }
  0x72   :  { %s1870_s27 = scalar_lea.hbm %s2741_s12, 16 }
  0x73   :  { %p1871_p12 = scmp.ne.s32.totalorder %s2741_s12, %s1870_s27  ;;  %p1874_p13 = scmp.lt.u32.totalorder %s1870_s27, %s2741_s12 }
  0x75   :  { %p1876_p0 = pnand %p1874_p13, %p1871_p12 }
  0x77   :  { %1879 = shalt.err (!%p1876_p0)
}
  0x78   :  { %s1880_s24 = scalar_lea.vmem %s168_s26, 16  ;;  %s1884_s5 = scalar_lea.vmem %s168_s26, 32 }
  0x79   :  { %p1881_p1 = scmp.ne.s32.totalorder %s168_s26, %s1880_s24  ;;  %p1885_p2 = scmp.lt.s32.totalorder %s168_s26, %s168_s26 }
  0x7a   :  { %p1886_p3 = scmp.lt.s32.totalorder %s1884_s5, %s1880_s24 }
  0x7c   :  { %p1887_p4 = por %p1886_p3, %p1885_p2 }
  0x7e   :  { %p1888_p5 = pnand %p1887_p4, %p1881_p1 }
  0x80   :  { %1891 = shalt.err (!%p1888_p5)
}
  0x81   :  { %170 = dma.hbm_to_vmem [thread:$0]  %s2741_s12, 16, %s168_s26, [#allocation22]  }
  0x82   :  { %s2184_s22 = smov [#allocation24]   ;;  %s2185_s8 = smov [#allocation27]  }
  0x83   :  { %s189_s23 = sshll.u32 %s2184_s22, 4  ;;  %s211_s30 = sshll.u32 %s2185_s8, 4  ;;  %s190_s23 = int_to_ptr.vmem [resolvable:$true] %s189_s23  ;;  %s212_s30 = int_to_ptr.vmem [resolvable:$true] %s211_s30 }
  0x84   :  { %s1892_s6 = scalar_lea.hbm %s2743_s14, 16 }
  0x85   :  { %p1893_p6 = scmp.ne.s32.totalorder %s2743_s14, %s1892_s6  ;;  %p1896_p7 = scmp.lt.u32.totalorder %s1892_s6, %s2743_s14 }
  0x87   :  { %p1898_p8 = pnand %p1896_p7, %p1893_p6 }
  0x89   :  { %1901 = shalt.err (!%p1898_p8)
}
  0x8a   :  { %s1902_s12 = scalar_lea.vmem %s190_s23, 16  ;;  %s1906_s26 = scalar_lea.vmem %s190_s23, 32 }
  0x8b   :  { %p1903_p9 = scmp.ne.s32.totalorder %s190_s23, %s1902_s12  ;;  %p1907_p10 = scmp.lt.s32.totalorder %s190_s23, %s190_s23 }
  0x8c   :  { %p1908_p11 = scmp.lt.s32.totalorder %s1906_s26, %s1902_s12 }
  0x8e   :  { %p1909_p12 = por %p1908_p11, %p1907_p10 }
  0x90   :  { %p1910_p13 = pnand %p1909_p12, %p1903_p9 }
  0x92   :  { %1913 = shalt.err (!%p1910_p13)
}
  0x93   :  { %192 = dma.hbm_to_vmem [thread:$0]  %s2743_s14, 16, %s190_s23, [#allocation25]  }
  0x94   :  { %s1914_s10 = scalar_lea.hbm %s2745_s16, 16 }
  0x95   :  { %p1915_p0 = scmp.ne.s32.totalorder %s2745_s16, %s1914_s10  ;;  %p1918_p1 = scmp.lt.u32.totalorder %s1914_s10, %s2745_s16 }
  0x97   :  { %p1920_p2 = pnand %p1918_p1, %p1915_p0 }
  0x99   :  { %1923 = shalt.err (!%p1920_p2)
}
  0x9a   :  { %s1924_s25 = scalar_lea.vmem %s212_s30, 16  ;;  %s1928_s6 = scalar_lea.vmem %s212_s30, 32 }
  0x9b   :  { %p1925_p3 = scmp.ne.s32.totalorder %s212_s30, %s1924_s25  ;;  %p1929_p4 = scmp.lt.s32.totalorder %s212_s30, %s212_s30 }
  0x9c   :  { %p1930_p5 = scmp.lt.s32.totalorder %s1928_s6, %s1924_s25 }
  0x9e   :  { %p1931_p6 = por %p1930_p5, %p1929_p4 }
  0xa0   :  { %p1932_p7 = pnand %p1931_p6, %p1925_p3 }
  0xa2   :  { %1935 = shalt.err (!%p1932_p7)
}
  0xa3   :  { %214 = dma.hbm_to_vmem [thread:$0]  %s2745_s16, 16, %s212_s30, [#allocation28]  }
  0xa4   :  { %s2186_s28 = smov [#allocation3]   ;;  %s2187_s29 = smov [#allocation8]  }
  0xa5   :  { %s42_s27 = sshll.u32 %s2186_s28, 4  ;;  %s67_s1 = sshll.u32 %s2187_s29, 4  ;;  %s43_s27 = int_to_ptr.vmem [resolvable:$true] %s42_s27  ;;  %s68_s1 = int_to_ptr.vmem [resolvable:$true] %s67_s1 }
  0xa6   :  { %s2768_s3 = sld [smem:[#allocation41_spill]] }
  0xac   :  { %s1936_s4 = scalar_lea.hbm %s2768_s3, 128 }
  0xad   :  { %p1937_p8 = scmp.ne.s32.totalorder %s2768_s3, %s1936_s4  ;;  %p1940_p9 = scmp.lt.u32.totalorder %s1936_s4, %s2768_s3 }
  0xaf   :  { %p1942_p10 = pnand %p1940_p9, %p1937_p8 }
  0xb1   :  { %1945 = shalt.err (!%p1942_p10)
}
  0xb2   :  { %s1946_s16 = scalar_lea.vmem %s43_s27, 128  ;;  %p1951_p12 = scmp.lt.s32.totalorder %s43_s27, %s43_s27 }
  0xb3   :  { %p1947_p11 = scmp.ne.s32.totalorder %s43_s27, %s1946_s16  ;;  %p1952_p13 = scmp.lt.s32.totalorder %s1946_s16, %s1946_s16 }
  0xb5   :  { %p1953_p0 = por %p1952_p13, %p1951_p12 }
  0xb7   :  { %p1954_p1 = pnand %p1953_p0, %p1947_p11 }
  0xb9   :  { %1957 = shalt.err (!%p1954_p1)
}
  0xba   :  { %s2769_s30 = smov 4   ;;  %s2770_s22 = smov 64  }
  0xbb   :  { %48 = dma.hbm_to_vmem [thread:$0]  %s2768_s3, 128, %s43_s27, [#allocation4], %s2770_s22, %s2770_s22, %s2769_s30  }
  0xbc   :  { %s2771_s14 = sld [smem:[#allocation43_spill]] }
  0xc2   :  { %s1958_s23 = scalar_lea.hbm %s2771_s14, 16 }
  0xc3   :  { %p1959_p2 = scmp.ne.s32.totalorder %s2771_s14, %s1958_s23  ;;  %p1962_p3 = scmp.lt.u32.totalorder %s1958_s23, %s2771_s14 }
  0xc5   :  { %p1964_p4 = pnand %p1962_p3, %p1959_p2 }
  0xc7   :  { %1967 = shalt.err (!%p1964_p4)
}
  0xc8   :  { %s1968_s4 = scalar_lea.vmem %s68_s1, 16  ;;  %s1972_s24 = scalar_lea.vmem %s68_s1, 32 }
  0xc9   :  { %p1969_p5 = scmp.ne.s32.totalorder %s68_s1, %s1968_s4  ;;  %p1973_p6 = scmp.lt.s32.totalorder %s68_s1, %s68_s1 }
  0xca   :  { %p1974_p7 = scmp.lt.s32.totalorder %s1972_s24, %s1968_s4 }
  0xcc   :  { %p1975_p8 = por %p1974_p7, %p1973_p6 }
  0xce   :  { %p1976_p9 = pnand %p1975_p8, %p1969_p5 }
  0xd0   :  { %1979 = shalt.err (!%p1976_p9)
}
  0xd1   :  { %70 = dma.hbm_to_vmem [thread:$0]  %s2771_s14, 16, %s68_s1, [#allocation7]  }
  0xd2   :  { %s2188_s5 = smov [#allocation11]   ;;  %s2189_s0 = smov [#allocation14]  }
  0xd3   :  { %s88_s10 = sshll.u32 %s2188_s5, 4  ;;  %s110_s16 = sshll.u32 %s2189_s0, 4  ;;  %s89_s10 = int_to_ptr.vmem [resolvable:$true] %s88_s10  ;;  %s2442_s16 = int_to_ptr.vmem [resolvable:$true] %s110_s16 }
  0xd4   :  { %s2772_s25 = sld [smem:[#allocation46_spill]] }
  0xda   :  { %s1980_s6 = scalar_lea.hbm %s2772_s25, 1024 }
  0xdb   :  { %p1981_p10 = scmp.ne.s32.totalorder %s2772_s25, %s1980_s6  ;;  %p1984_p11 = scmp.lt.u32.totalorder %s1980_s6, %s2772_s25 }
  0xdd   :  { %p1986_p12 = pnand %p1984_p11, %p1981_p10 }
  0xdf   :  { %1989 = shalt.err (!%p1986_p12)
}
  0xe0   :  { %s1990_s1 = scalar_lea.vmem %s89_s10, 1024  ;;  %p1995_p0 = scmp.lt.s32.totalorder %s89_s10, %s89_s10 }
  0xe1   :  { %p1991_p13 = scmp.ne.s32.totalorder %s89_s10, %s1990_s1  ;;  %p1996_p1 = scmp.lt.s32.totalorder %s1990_s1, %s1990_s1 }
  0xe3   :  { %p1997_p2 = por %p1996_p1, %p1995_p0 }
  0xe5   :  { %p1998_p3 = pnand %p1997_p2, %p1991_p13 }
  0xe7   :  { %2001 = shalt.err (!%p1998_p3)
}
  0xe8   :  { %94 = dma.hbm_to_vmem [thread:$0]  %s2772_s25, 1024, %s89_s10, [#allocation10], %s2770_s22, %s2770_s22, %s2769_s30  }
  0xe9   :  { %s2002_s27 = scalar_lea.hbm %s2736_s7, 1024 }
  0xea   :  { %p2003_p4 = scmp.ne.s32.totalorder %s2736_s7, %s2002_s27  ;;  %p2006_p5 = scmp.lt.u32.totalorder %s2002_s27, %s2736_s7 }
  0xec   :  { %p2008_p6 = pnand %p2006_p5, %p2003_p4 }
  0xee   :  { %2011 = shalt.err (!%p2008_p6)
}
  0xef   :  { %s2012_s2 = scalar_lea.vmem %s2442_s16, 1024  ;;  %p2017_p8 = scmp.lt.s32.totalorder %s2442_s16, %s2442_s16 }
  0xf0   :  { %p2013_p7 = scmp.ne.s32.totalorder %s2442_s16, %s2012_s2  ;;  %p2018_p9 = scmp.lt.s32.totalorder %s2012_s2, %s2012_s2 }
  0xf2   :  { %p2019_p10 = por %p2018_p9, %p2017_p8 }
  0xf4   :  { %p2020_p11 = pnand %p2019_p10, %p2013_p7 }
  0xf6   :  { %2023 = shalt.err (!%p2020_p11)
}
  0xf7   :  { %116 = dma.hbm_to_vmem [thread:$0]  %s2736_s7, 1024, %s2442_s16, [#allocation13], %s2770_s22, %s2770_s22, %s2769_s30  }
  0xf8   :  { %s2190_s6 = smov [#allocation17]   ;;  %s2191_s28 = smov [#allocation20]  }
  0xf9   :  { %s132_s23 = sshll.u32 %s2190_s6, 4  ;;  %s154_s29 = sshll.u32 %s2191_s28, 4  ;;  %s133_s23 = int_to_ptr.vmem [resolvable:$true] %s132_s23  ;;  %s2479_s29 = int_to_ptr.vmem [resolvable:$true] %s154_s29 }
  0xfa   :  { %s2024_s14 = scalar_lea.hbm %s2738_s9, 1024 }
  0xfb   :  { %p2025_p12 = scmp.ne.s32.totalorder %s2738_s9, %s2024_s14  ;;  %p2028_p13 = scmp.lt.u32.totalorder %s2024_s14, %s2738_s9 }
  0xfd   :  { %p2030_p0 = pnand %p2028_p13, %p2025_p12 }
  0xff   :  { %2033 = shalt.err (!%p2030_p0)
}
 0x100   :  { %s2034_s7 = scalar_lea.vmem %s133_s23, 1024  ;;  %p2039_p2 = scmp.lt.s32.totalorder %s133_s23, %s133_s23 }
 0x101   :  { %p2035_p1 = scmp.ne.s32.totalorder %s133_s23, %s2034_s7  ;;  %p2040_p3 = scmp.lt.s32.totalorder %s2034_s7, %s2034_s7 }
 0x103   :  { %p2041_p4 = por %p2040_p3, %p2039_p2 }
 0x105   :  { %p2042_p5 = pnand %p2041_p4, %p2035_p1 }
 0x107   :  { %2045 = shalt.err (!%p2042_p5)
}
 0x108   :  { %138 = dma.hbm_to_vmem [thread:$0]  %s2738_s9, 1024, %s133_s23, [#allocation16], %s2770_s22, %s2770_s22, %s2769_s30  }
 0x109   :  { %s2046_s8 = scalar_lea.hbm %s2740_s11, 1024 }
 0x10a   :  { %p2047_p6 = scmp.ne.s32.totalorder %s2740_s11, %s2046_s8  ;;  %p2050_p7 = scmp.lt.u32.totalorder %s2046_s8, %s2740_s11 }
 0x10c   :  { %p2052_p8 = pnand %p2050_p7, %p2047_p6 }
 0x10e   :  { %2055 = shalt.err (!%p2052_p8)
}
 0x10f   :  { %s2056_s28 = scalar_lea.vmem %s2479_s29, 1024  ;;  %p2061_p10 = scmp.lt.s32.totalorder %s2479_s29, %s2479_s29 }
 0x110   :  { %p2057_p9 = scmp.ne.s32.totalorder %s2479_s29, %s2056_s28  ;;  %p2062_p11 = scmp.lt.s32.totalorder %s2056_s28, %s2056_s28 }
 0x112   :  { %p2063_p12 = por %p2062_p11, %p2061_p10 }
 0x114   :  { %p2064_p13 = pnand %p2063_p12, %p2057_p9 }
 0x116   :  { %2067 = shalt.err (!%p2064_p13)
}
 0x117   :  { %160 = dma.hbm_to_vmem [thread:$0]  %s2740_s11, 1024, %s2479_s29, [#allocation19], %s2770_s22, %s2770_s22, %s2769_s30  }
 0x118   :  { %s2192_s12 = smov [#allocation23]   ;;  %s2193_s14 = smov [#allocation26]  }
 0x119   :  { %s176_s1 = sshll.u32 %s2192_s12, 4  ;;  %s198_s26 = sshll.u32 %s2193_s14, 4  ;;  %s177_s1 = int_to_ptr.vmem [resolvable:$true] %s176_s1  ;;  %s2516_s26 = int_to_ptr.vmem [resolvable:$true] %s198_s26 }
 0x11a   :  { %s2068_s27 = scalar_lea.hbm %s2742_s13, 1024 }
 0x11b   :  { %p2069_p0 = scmp.ne.s32.totalorder %s2742_s13, %s2068_s27  ;;  %p2072_p1 = scmp.lt.u32.totalorder %s2068_s27, %s2742_s13 }
 0x11d   :  { %p2074_p2 = pnand %p2072_p1, %p2069_p0 }
 0x11f   :  { %2077 = shalt.err (!%p2074_p2)
}
 0x120   :  { %s2078_s11 = scalar_lea.vmem %s177_s1, 1024  ;;  %p2083_p4 = scmp.lt.s32.totalorder %s177_s1, %s177_s1 }
 0x121   :  { %p2079_p3 = scmp.ne.s32.totalorder %s177_s1, %s2078_s11  ;;  %p2084_p5 = scmp.lt.s32.totalorder %s2078_s11, %s2078_s11 }
 0x123   :  { %p2085_p6 = por %p2084_p5, %p2083_p4 }
 0x125   :  { %p2086_p7 = pnand %p2085_p6, %p2079_p3 }
 0x127   :  { %2089 = shalt.err (!%p2086_p7)
}
 0x128   :  { %182 = dma.hbm_to_vmem [thread:$0]  %s2742_s13, 1024, %s177_s1, [#allocation22], %s2770_s22, %s2770_s22, %s2769_s30  }
 0x129   :  { %s2090_s10 = scalar_lea.hbm %s2744_s15, 1024 }
 0x12a   :  { %p2091_p8 = scmp.ne.s32.totalorder %s2744_s15, %s2090_s10  ;;  %p2094_p9 = scmp.lt.u32.totalorder %s2090_s10, %s2744_s15 }
 0x12c   :  { %p2096_p10 = pnand %p2094_p9, %p2091_p8 }
 0x12e   :  { %2099 = shalt.err (!%p2096_p10)
}
 0x12f   :  { %s2100_s23 = scalar_lea.vmem %s2516_s26, 1024  ;;  %p2105_p12 = scmp.lt.s32.totalorder %s2516_s26, %s2516_s26 }
 0x130   :  { %p2101_p11 = scmp.ne.s32.totalorder %s2516_s26, %s2100_s23  ;;  %p2106_p13 = scmp.lt.s32.totalorder %s2100_s23, %s2100_s23 }
 0x132   :  { %p2107_p0 = por %p2106_p13, %p2105_p12 }
 0x134   :  { %p2108_p1 = pnand %p2107_p0, %p2101_p11 }
 0x136   :  { %2111 = shalt.err (!%p2108_p1)
}
 0x137   :  { %204 = dma.hbm_to_vmem [thread:$0]  %s2744_s15, 1024, %s2516_s26, [#allocation25], %s2770_s22, %s2770_s22, %s2769_s30  }
 0x138   :  { %s2194_s1 = smov [#allocation29]   ;;  %s2112_s27 = scalar_lea.hbm %s2748_s19, 1024 }
 0x139   :  { %s224_s14 = sshll.u32 %s2194_s1, 4  ;;  %p2113_p2 = scmp.ne.s32.totalorder %s2748_s19, %s2112_s27  ;;  %s225_s14 = int_to_ptr.vmem [resolvable:$true] %s224_s14 }
 0x13a   :  { %p2116_p3 = scmp.lt.u32.totalorder %s2112_s27, %s2748_s19 }
 0x13c   :  { %p2118_p4 = pnand %p2116_p3, %p2113_p2 }
 0x13e   :  { %2121 = shalt.err (!%p2118_p4)
}
 0x13f   :  { %s2122_s11 = scalar_lea.vmem %s225_s14, 1024  ;;  %p2127_p6 = scmp.lt.s32.totalorder %s225_s14, %s225_s14 }
 0x140   :  { %p2123_p5 = scmp.ne.s32.totalorder %s225_s14, %s2122_s11  ;;  %p2128_p7 = scmp.lt.s32.totalorder %s2122_s11, %s2122_s11 }
 0x142   :  { %p2129_p8 = por %p2128_p7, %p2127_p6 }
 0x144   :  { %p2130_p9 = pnand %p2129_p8, %p2123_p5 }
 0x146   :  { %2133 = shalt.err (!%p2130_p9)
}
 0x147   :  { %230 = dma.hbm_to_vmem [thread:$0]  %s2748_s19, 1024, %s225_s14, [#allocation28], %s2770_s22, %s2770_s22, %s2769_s30  }
 0x148   :  { %2156 = dma.done.wait [#allocation4], 128  }
 0x149   :  { %2157 = vsyncadd [#allocation4], 4294967168 }
 0x14a   :  { %2158 = dma.done.wait [#allocation7], 144  }
 0x14b   :  { %2159 = vsyncadd [#allocation7], 4294967152 }
 0x14c   :  { %2160 = dma.done.wait [#allocation10], 1040  }
 0x14d   :  { %2161 = vsyncadd [#allocation10], 4294966256 }
 0x14e   :  { %2162 = dma.done.wait [#allocation13], 1040  }
 0x14f   :  { %2163 = vsyncadd [#allocation13], 4294966256 }
 0x150   :  { %2164 = dma.done.wait [#allocation16], 1040  }
 0x151   :  { %2165 = vsyncadd [#allocation16], 4294966256 }
 0x152   :  { %2166 = dma.done.wait [#allocation19], 1040  }
 0x153   :  { %2167 = vsyncadd [#allocation19], 4294966256 }
 0x154   :  { %2168 = dma.done.wait [#allocation22], 1040  }
 0x155   :  { %2169 = vsyncadd [#allocation22], 4294966256 }
 0x156   :  { %2170 = dma.done.wait [#allocation25], 1040  }
 0x157   :  { %2171 = vsyncadd [#allocation25], 4294966256 }
 0x158   :  { %2172 = dma.done.wait [#allocation28], 1040  }
 0x159   :  { %2173 = vsyncadd [#allocation28], 4294966256  ;;  %v2195_v0 = vmov 0.0   ;;  %vm2196_vm0 = vmmov 0   ;;  %v1686_v1 = vld [vmem:[#allocation6] sm:$0xff]   ;;  %v1687_v2 = vld [vmem:[#allocation3] sm:$0xff]  }
 0x15a   :  { %1498 = vmatprep.subr.bf16.mxu0 %v2195_v0  ;;  %1500 = vmatprep.mubr.msk.bf16.mxu0 %vm2196_vm0, %v2195_v0  ;;  %vm307_vm1 = vcmask 130048   ;;  %v1336_v3 = vld [vmem:[#allocation8] ss:$0 sm:$0xff]  ;;  %v1340_v8 = vld [vmem:[#allocation9] ss:$0 sm:$0xff]  ;;  %v1688_v15 = vld [vmem:[#allocation11] sm:$0xff]  }
 0x15b   :  { %1504 = vmatprep.subr.bf16.mxu1 %v2195_v0  ;;  %1520 = vmatprep.mubr.msk.bf16.mxu1 %vm2196_vm0, %v2195_v0  ;;  %v1689_v16 = vld [vmem:[#allocation11 + $0x8] sm:$0xff]   ;;  %v1690_v17 = vld [vmem:[#allocation11 + $0x10] sm:$0xff]   ;;  %v1691_v18 = vld [vmem:[#allocation11 + $0x18] sm:$0xff]   ;;  %s2773_s0 = sld [smem:[#allocation45_spill]]  ;;  %s2197_s11 = smov [#allocation30]  }
 0x15c   :  { %1499 = vmatpush3.bf16.msra.mxu0 %v1686_v1  ;;  %1505 = vmatpush3.bf16.msra.mxu1 %v1688_v15  ;;  %v1692_v19 = vld [vmem:[#allocation11 + $0x20] sm:$0xff]   ;;  %v1693_v20 = vld [vmem:[#allocation11 + $0x28] sm:$0xff]   ;;  %v1694_v21 = vld [vmem:[#allocation11 + $0x30] sm:$0xff]   ;;  %s1316_s15 = sshll.u32 %s2197_s11, 4  ;;  %s1317_s15 = int_to_ptr.vmem [resolvable:$true] %s1316_s15 }
 0x15d   :  { %1524 = vmatprep.subr.bf16.mxu0 %v2195_v0  ;;  %1506 = vmatprep.subr.bf16.mxu1 %v2195_v0  ;;  %v1695_v22 = vld [vmem:[#allocation11 + $0x38] sm:$0xff]   ;;  %v1696_v23 = vld [vmem:[#allocation14] sm:$0xff]   ;;  %v1697_v24 = vld [vmem:[#allocation14 + $0x8] sm:$0xff]   ;;  %p2139_p11 = scmp.lt.s32.totalorder %s1317_s15, %s1317_s15 }
 0x15e   :  { %v1698_v25 = vld [vmem:[#allocation14 + $0x10] sm:$0xff]   ;;  %v1699_v26 = vld [vmem:[#allocation14 + $0x18] sm:$0xff]   ;;  %v1700_v27 = vld [vmem:[#allocation14 + $0x20] sm:$0xff]  }
 0x15f   :  { %1501 = vmatmul.mubr.msk.bf16.vlgmr.msra.gmra.mrb[0].mxu0 %vm307_vm1, %v1687_v2  ;;  %v1701_v28 = vld [vmem:[#allocation14 + $0x28] sm:$0xff]   ;;  %v1702_v45 = vld [vmem:[#allocation14 + $0x30] sm:$0xff]   ;;  %v1703_v46 = vld [vmem:[#allocation14 + $0x38] sm:$0xff]  }
 0x160   :  { %1540 = vmatprep.mubr.msk.bf16.mxu0 %vm2196_vm0, %v2195_v0  ;;  %1507 = vmatpush3.bf16.msra.mxu1 %v1689_v16  ;;  %v1704_v47 = vld [vmem:[#allocation17] sm:$0xff]   ;;  %v1705_v48 = vld [vmem:[#allocation17 + $0x8] sm:$0xff]   ;;  %v1706_v49 = vld [vmem:[#allocation17 + $0x10] sm:$0xff]  }
 0x161   :  { %1508 = vmatprep.subr.bf16.mxu1 %v2195_v0  ;;  %1525 = vmatpush3.bf16.msra.mxu0 %v1696_v23  ;;  %v368_v29 = vstv %s2773_s0  ;;  %v1707_v50 = vld [vmem:[#allocation17 + $0x18] sm:$0xff]   ;;  %v1708_v51 = vld [vmem:[#allocation17 + $0x20] sm:$0xff]   ;;  %v1709_v52 = vld [vmem:[#allocation17 + $0x28] sm:$0xff]  }
 0x162   :  { %1526 = vmatprep.subr.bf16.mxu0 %v2195_v0  ;;  %v1343_v53 = vld [vmem:[#allocation12] ss:$0 sm:$0xff]  ;;  %v1710_v63 = vld [vmem:[#allocation17 + $0x30] sm:$0xff]   ;;  %v1712_v2 = vld [vmem:[#allocation20] sm:$0xff]  }
 0x163   :  { %v1711_v1 = vld [vmem:[#allocation17 + $0x38] sm:$0xff]   ;;  %v1725_v23 = vld [vmem:[#allocation23 + $0x28] sm:$0xff]  }
 0x164   :  { %1509 = vmatpush3.bf16.msra.mxu1 %v1690_v17  ;;  %v1718_v16 = vld [vmem:[#allocation20 + $0x30] sm:$0xff]   ;;  %v1719_v17 = vld [vmem:[#allocation20 + $0x38] sm:$0xff]  }
 0x165   :  { %1510 = vmatprep.subr.bf16.mxu1 %v2195_v0  ;;  %1527 = vmatpush3.bf16.msra.mxu0 %v1697_v24  ;;  %v1361_v24 = vld [vmem:[#allocation18] ss:$0 sm:$0xff] }
 0x166   :  { %1528 = vmatprep.subr.bf16.mxu0 %v2195_v0 }
 0x168   :  { %1511 = vmatpush3.bf16.msra.mxu1 %v1691_v18  ;;  %v1720_v18 = vld [vmem:[#allocation23] sm:$0xff]  }
 0x169   :  { %1512 = vmatprep.subr.bf16.mxu1 %v2195_v0  ;;  %1529 = vmatpush3.bf16.msra.mxu0 %v1698_v25 }
 0x16a   :  { %1530 = vmatprep.subr.bf16.mxu0 %v2195_v0 }
 0x16c   :  { %1513 = vmatpush3.bf16.msra.mxu1 %v1692_v19  ;;  %v1721_v19 = vld [vmem:[#allocation23 + $0x8] sm:$0xff]  }
 0x16d   :  { %1514 = vmatprep.subr.bf16.mxu1 %v2195_v0  ;;  %1531 = vmatpush3.bf16.msra.mxu0 %v1699_v26 }
 0x16e   :  { %1532 = vmatprep.subr.bf16.mxu0 %v2195_v0 }
 0x170   :  { %1515 = vmatpush3.bf16.msra.mxu1 %v1693_v20  ;;  %v1722_v20 = vld [vmem:[#allocation23 + $0x10] sm:$0xff]  }
 0x171   :  { %1516 = vmatprep.subr.bf16.mxu1 %v2195_v0  ;;  %1533 = vmatpush3.bf16.msra.mxu0 %v1700_v27 }
 0x172   :  { %1534 = vmatprep.subr.bf16.mxu0 %v2195_v0 }
 0x174   :  { %1517 = vmatpush3.bf16.msra.mxu1 %v1694_v21  ;;  %v1723_v21 = vld [vmem:[#allocation23 + $0x18] sm:$0xff]  }
 0x175   :  { %1518 = vmatprep.subr.bf16.mxu1 %v2195_v0  ;;  %1535 = vmatpush3.bf16.msra.mxu0 %v1701_v28 }
 0x176   :  { %1536 = vmatprep.subr.bf16.mxu0 %v2195_v0 }
 0x178   :  { %1519 = vmatpush3.bf16.msra.mxu1 %v1695_v22  ;;  %v1724_v22 = vld [vmem:[#allocation23 + $0x20] sm:$0xff]  }
 0x179   :  { %1544 = vmatprep.subr.bf16.mxu1 %v2195_v0  ;;  %1537 = vmatpush3.bf16.msra.mxu0 %v1702_v45 }
 0x17a   :  { %1538 = vmatprep.subr.bf16.mxu0 %v2195_v0 }
 0x17d   :  { %1539 = vmatpush3.bf16.msra.mxu0 %v1703_v46 }
 0x17e   :  { %1564 = vmatprep.subr.bf16.mxu0 %v2195_v0 }
 0x232   :  { %v345_v4 = vpop.f32.mrb[0].mxu0 }
 0x233   :  { %v2577_v5 = vadd.f32 %v1336_v3, %v345_v4  ;;  %v1502_v6 = vpop.f32.mrb[1].mxu0  ;;  %v1714_v4 = vld [vmem:[#allocation20 + $0x10] sm:$0xff]  }
 0x234   :  { %v348_v7 = vpop.f32.mrb[2].mxu0  ;;  %v1716_v6 = vld [vmem:[#allocation20 + $0x20] sm:$0xff]  }
 0x235   :  { %v352_v9 = vmax.f32 %v2577_v5, 0.0  ;;  %v2580_v10 = vadd.f32 %v1336_v3, %v348_v7  ;;  %v1503_v11 = vpop.f32.mrb[3].mxu0  ;;  %v1713_v3 = vld [vmem:[#allocation20 + $0x8] sm:$0xff]   ;;  %v1715_v5 = vld [vmem:[#allocation20 + $0x18] sm:$0xff]  }
 0x236   :  { %v1717_v7 = vld [vmem:[#allocation20 + $0x28] sm:$0xff]  }
 0x237   :  { %v353_v12 = vmax.f32 %v2580_v10, 0.0  ;;  %v361_v13 = vmul.f32 %v1340_v8, %v352_v9 }
 0x239   :  { %363 = vadd.xlane.f32.xlu0 %v361_v13  ;;  %v362_v14 = vmul.f32 %v1340_v8, %v353_v12  ;;  %v1352_v8 = vld [vmem:[#allocation15] ss:$0 sm:$0xff] }
 0x23d   :  { %365 = vadd.xlane.f32.xlu0 %v362_v14 }
 0x2c6   :  { %v364_v30 = vpop.xlane.xlu0 %363 }
 0x2c7   :  { %v369_v31 = vadd.f32 %v368_v29, %v364_v30 }
 0x2c9   :  { %v1341_v32 = vmul.f32 -1.442695, %v369_v31 }
 0x2ca   :  { %v366_v33 = vpop.xlane.xlu0 %365 }
 0x2cb   :  { %1752 = vpow2.f32 %v1341_v32  ;;  %v370_v34 = vadd.f32 %v368_v29, %v366_v33 }
 0x2cd   :  { %v1342_v35 = vmul.f32 -1.442695, %v370_v34  ;;  %v1726_v34 = vld [vmem:[#allocation23 + $0x30] sm:$0xff]  }
 0x2cf   :  { %1754 = vpow2.f32 %v1342_v35  ;;  %v1727_v35 = vld [vmem:[#allocation23 + $0x38] sm:$0xff]  }
 0x2d5   :  { %v1753_v36 = vpop.eup %1752 }
 0x2d6   :  { %v377_v37 = vadd.f32 1.0, %v1753_v36  ;;  %v1728_v36 = vld [vmem:[#allocation26] sm:$0xff]  }
 0x2d8   :  { %1756 = vrcp.f32 %v377_v37  ;;  %v1729_v37 = vld [vmem:[#allocation26 + $0x8] sm:$0xff]  }
 0x2d9   :  { %v1755_v38 = vpop.eup %1754 }
 0x2da   :  { %v378_v39 = vadd.f32 1.0, %v1755_v38  ;;  %v1730_v38 = vld [vmem:[#allocation26 + $0x10] sm:$0xff]  }
 0x2dc   :  { %1758 = vrcp.f32 %v378_v39  ;;  %v1731_v39 = vld [vmem:[#allocation26 + $0x18] sm:$0xff]  }
 0x2e2   :  { %v1757_v40 = vpop.eup %1756 }
 0x2e3   :  { %v383_v42 = vmul.f32 %v1757_v40, %v352_v9  ;;  %v1732_v40 = vld [vmem:[#allocation26 + $0x20] sm:$0xff]  }
 0x2e6   :  { %v1759_v41 = vpop.eup %1758 }
 0x2e7   :  { %v384_v43 = vmul.f32 %v1759_v41, %v353_v12  ;;  %v1733_v41 = vld [vmem:[#allocation26 + $0x28] sm:$0xff]  }
 0x2e9   :  { %v385_v44 = vpack.c.bf16 %v384_v43, %v383_v42  ;;  %v1370_v42 = vld [vmem:[#allocation21] ss:$0 sm:$0xff] }
 0x2eb   :  { %1521 = vmatmul.mubr.bf16.vlgmr.msra.gmra.mrb[0].mxu1 %v385_v44 }
 0x2ec   :  { %1560 = vmatprep.mubr.msk.bf16.mxu1 %vm2196_vm0, %v2195_v0  ;;  %1545 = vmatpush3.bf16.msra.mxu1 %v1704_v47 }
 0x2ed   :  { %1546 = vmatprep.subr.bf16.mxu1 %v2195_v0 }
 0x2f0   :  { %1547 = vmatpush3.bf16.msra.mxu1 %v1705_v48 }
 0x2f1   :  { %1548 = vmatprep.subr.bf16.mxu1 %v2195_v0 }
 0x2f4   :  { %1549 = vmatpush3.bf16.msra.mxu1 %v1706_v49 }
 0x2f5   :  { %1550 = vmatprep.subr.bf16.mxu1 %v2195_v0 }
 0x2f8   :  { %1551 = vmatpush3.bf16.msra.mxu1 %v1707_v50 }
 0x2f9   :  { %1552 = vmatprep.subr.bf16.mxu1 %v2195_v0 }
 0x2fc   :  { %1553 = vmatpush3.bf16.msra.mxu1 %v1708_v51 }
 0x2fd   :  { %1554 = vmatprep.subr.bf16.mxu1 %v2195_v0 }
 0x300   :  { %1555 = vmatpush3.bf16.msra.mxu1 %v1709_v52  ;;  %v1734_v52 = vld [vmem:[#allocation26 + $0x30] sm:$0xff]  }
 0x301   :  { %1556 = vmatprep.subr.bf16.mxu1 %v2195_v0 }
 0x304   :  { %1557 = vmatpush3.bf16.msra.mxu1 %v1710_v63 }
 0x305   :  { %1558 = vmatprep.subr.bf16.mxu1 %v2195_v0 }
 0x308   :  { %1559 = vmatpush3.bf16.msra.mxu1 %v1711_v1 }
 0x309   :  { %1584 = vmatprep.subr.bf16.mxu1 %v2195_v0 }
 0x3be   :  { %v491_v54 = vpop.f32.mrb[0].mxu1 }
 0x3bf   :  { %v492_v55 = vadd.f32 %v1343_v53, %v491_v54  ;;  %v1522_v56 = vpop.f32.mrb[1].mxu1  ;;  %v1736_v54 = vld [vmem:[%s2746_s17] sm:$0xff]  }
 0x3c0   :  { %v494_v57 = vpop.f32.mrb[2].mxu1  ;;  %v1738_v56 = vld [vmem:[%s2746_s17 + $0x10] sm:$0xff]  }
 0x3c1   :  { %v495_v58 = vadd.f32 %v1343_v53, %v494_v57  ;;  %v1523_v59 = vpop.f32.mrb[3].mxu1  ;;  %v498_v60 = vmax.f32 %v492_v55, 0.0  ;;  %v1735_v53 = vld [vmem:[#allocation26 + $0x38] sm:$0xff]   ;;  %v1737_v55 = vld [vmem:[%s2746_s17 + $0x8] sm:$0xff]  }
 0x3c2   :  { %v1739_v57 = vld [vmem:[%s2746_s17 + $0x18] sm:$0xff]   ;;  %v1741_v59 = vld [vmem:[%s2746_s17 + $0x28] sm:$0xff]  }
 0x3c3   :  { %v499_v61 = vmax.f32 %v495_v58, 0.0  ;;  %v1740_v58 = vld [vmem:[%s2746_s17 + $0x20] sm:$0xff]  }
 0x3c5   :  { %v500_v62 = vpack.c.bf16 %v499_v61, %v498_v60  ;;  %v1379_v60 = vld [vmem:[#allocation24] ss:$0 sm:$0xff] }
 0x3c7   :  { %1541 = vmatmul.mubr.bf16.vlgmr.msra.gmra.mrb[4].mxu0 %v500_v62 }
 0x3c8   :  { %1580 = vmatprep.mubr.msk.bf16.mxu0 %vm2196_vm0, %v2195_v0  ;;  %1565 = vmatpush3.bf16.msra.mxu0 %v1712_v2 }
 0x3c9   :  { %1566 = vmatprep.subr.bf16.mxu0 %v2195_v0 }
 0x3cc   :  { %1567 = vmatpush3.bf16.msra.mxu0 %v1713_v3 }
 0x3cd   :  { %1568 = vmatprep.subr.bf16.mxu0 %v2195_v0 }
 0x3d0   :  { %1569 = vmatpush3.bf16.msra.mxu0 %v1714_v4 }
 0x3d1   :  { %1570 = vmatprep.subr.bf16.mxu0 %v2195_v0 }
 0x3d4   :  { %1571 = vmatpush3.bf16.msra.mxu0 %v1715_v5 }
 0x3d5   :  { %1572 = vmatprep.subr.bf16.mxu0 %v2195_v0 }
 0x3d8   :  { %1573 = vmatpush3.bf16.msra.mxu0 %v1716_v6 }
 0x3d9   :  { %1574 = vmatprep.subr.bf16.mxu0 %v2195_v0 }
 0x3dc   :  { %1575 = vmatpush3.bf16.msra.mxu0 %v1717_v7  ;;  %v1742_v7 = vld [vmem:[%s2746_s17 + $0x30] sm:$0xff]  }
 0x3dd   :  { %1576 = vmatprep.subr.bf16.mxu0 %v2195_v0 }
 0x3e0   :  { %1577 = vmatpush3.bf16.msra.mxu0 %v1718_v16 }
 0x3e1   :  { %1578 = vmatprep.subr.bf16.mxu0 %v2195_v0 }
 0x3e4   :  { %1579 = vmatpush3.bf16.msra.mxu0 %v1719_v17 }
 0x3e5   :  { %1604 = vmatprep.subr.bf16.mxu0 %v2195_v0 }
 0x49a   :  { %v606_v9 = vpop.f32.mrb[4].mxu0 }
 0x49b   :  { %v1542_v10 = vpop.f32.mrb[5].mxu0  ;;  %v2628_v12 = vadd.f32 %v1352_v8, %v606_v9  ;;  %v1744_v9 = vld [vmem:[#allocation29] sm:$0xff]  }
 0x49c   :  { %v609_v11 = vpop.f32.mrb[6].mxu0  ;;  %v1745_v10 = vld [vmem:[#allocation29 + $0x8] sm:$0xff]  }
 0x49d   :  { %v2630_v13 = vadd.f32 %v1352_v8, %v609_v11  ;;  %v1543_v14 = vpop.f32.mrb[7].mxu0  ;;  %v1743_v8 = vld [vmem:[%s2746_s17 + $0x38] sm:$0xff]   ;;  %v1746_v11 = vld [vmem:[#allocation29 + $0x10] sm:$0xff]  }
 0x49e   :  { %v1749_v14 = vld [vmem:[#allocation29 + $0x28] sm:$0xff]  }
 0x49f   :  { %v613_v15 = vpack.c.bf16 %v2630_v13, %v2628_v12 }
 0x4a1   :  { %1561 = vmatmul.mubr.bf16.vlgmr.msra.gmra.mrb[4].mxu1 %v613_v15  ;;  %v1388_v15 = vld [vmem:[#allocation27] ss:$0 sm:$0xff] }
 0x4a2   :  { %1600 = vmatprep.mubr.msk.bf16.mxu1 %vm2196_vm0, %v2195_v0  ;;  %1585 = vmatpush3.bf16.msra.mxu1 %v1720_v18 }
 0x4a3   :  { %1586 = vmatprep.subr.bf16.mxu1 %v2195_v0 }
 0x4a6   :  { %1587 = vmatpush3.bf16.msra.mxu1 %v1721_v19 }
 0x4a7   :  { %1588 = vmatprep.subr.bf16.mxu1 %v2195_v0 }
 0x4aa   :  { %1589 = vmatpush3.bf16.msra.mxu1 %v1722_v20 }
 0x4ab   :  { %1590 = vmatprep.subr.bf16.mxu1 %v2195_v0 }
 0x4ae   :  { %1591 = vmatpush3.bf16.msra.mxu1 %v1723_v21 }
 0x4af   :  { %1592 = vmatprep.subr.bf16.mxu1 %v2195_v0 }
 0x4b2   :  { %1593 = vmatpush3.bf16.msra.mxu1 %v1724_v22 }
 0x4b3   :  { %1594 = vmatprep.subr.bf16.mxu1 %v2195_v0 }
 0x4b6   :  { %1595 = vmatpush3.bf16.msra.mxu1 %v1725_v23 }
 0x4b7   :  { %1596 = vmatprep.subr.bf16.mxu1 %v2195_v0 }
 0x4ba   :  { %1597 = vmatpush3.bf16.msra.mxu1 %v1726_v34 }
 0x4bb   :  { %1598 = vmatprep.subr.bf16.mxu1 %v2195_v0 }
 0x4be   :  { %1599 = vmatpush3.bf16.msra.mxu1 %v1727_v35 }
 0x4bf   :  { %1624 = vmatprep.subr.bf16.mxu1 %v2195_v0 }
 0x574   :  { %v719_v25 = vpop.f32.mrb[4].mxu1 }
 0x575   :  { %v720_v26 = vadd.f32 %v1361_v24, %v719_v25  ;;  %v1562_v27 = vpop.f32.mrb[5].mxu1  ;;  %v1750_v25 = vld [vmem:[#allocation29 + $0x30] sm:$0xff]  }
 0x576   :  { %v722_v28 = vpop.f32.mrb[6].mxu1  ;;  %v1397_v27 = vld [vmem:[%s2747_s18] ss:$0 sm:$0xff]  ;;  %s2134_s18 = scalar_lea.vmem %s1317_s15, 128 }
 0x577   :  { %v723_v29 = vadd.f32 %v1361_v24, %v722_v28  ;;  %v1563_v30 = vpop.f32.mrb[7].mxu1  ;;  %v726_v31 = vmax.f32 %v720_v26, 0.0  ;;  %v1751_v26 = vld [vmem:[#allocation29 + $0x38] sm:$0xff]   ;;  %p2135_p10 = scmp.ne.s32.totalorder %s1317_s15, %s2134_s18  ;;  %p2140_p12 = scmp.lt.s32.totalorder %s2134_s18, %s2134_s18 }
 0x579   :  { %v727_v32 = vmax.f32 %v723_v29, 0.0  ;;  %p2141_p13 = por %p2140_p12, %p2139_p11 }
 0x57b   :  { %v728_v33 = vpack.c.bf16 %v727_v32, %v726_v31  ;;  %p2142_p0 = pnand %p2141_p13, %p2135_p10 }
 0x57d   :  { %1581 = vmatmul.mubr.bf16.vlgmr.msra.gmra.mrb[8].mxu0 %v728_v33 }
 0x57e   :  { %1620 = vmatprep.mubr.msk.bf16.mxu0 %vm2196_vm0, %v2195_v0  ;;  %1605 = vmatpush3.bf16.msra.mxu0 %v1728_v36 }
 0x57f   :  { %1606 = vmatprep.subr.bf16.mxu0 %v2195_v0 }
 0x582   :  { %1607 = vmatpush3.bf16.msra.mxu0 %v1729_v37 }
 0x583   :  { %1608 = vmatprep.subr.bf16.mxu0 %v2195_v0 }
 0x586   :  { %1609 = vmatpush3.bf16.msra.mxu0 %v1730_v38 }
 0x587   :  { %1610 = vmatprep.subr.bf16.mxu0 %v2195_v0 }
 0x58a   :  { %1611 = vmatpush3.bf16.msra.mxu0 %v1731_v39 }
 0x58b   :  { %1612 = vmatprep.subr.bf16.mxu0 %v2195_v0 }
 0x58e   :  { %1613 = vmatpush3.bf16.msra.mxu0 %v1732_v40 }
 0x58f   :  { %1614 = vmatprep.subr.bf16.mxu0 %v2195_v0 }
 0x592   :  { %1615 = vmatpush3.bf16.msra.mxu0 %v1733_v41 }
 0x593   :  { %1616 = vmatprep.subr.bf16.mxu0 %v2195_v0 }
 0x596   :  { %1617 = vmatpush3.bf16.msra.mxu0 %v1734_v52 }
 0x597   :  { %1618 = vmatprep.subr.bf16.mxu0 %v2195_v0 }
 0x59a   :  { %1619 = vmatpush3.bf16.msra.mxu0 %v1735_v53 }
 0x59b   :  { %1644 = vmatprep.subr.bf16.mxu0 %v2195_v0 }
 0x650   :  { %v834_v43 = vpop.f32.mrb[8].mxu0 }
 0x651   :  { %v835_v44 = vadd.f32 %v1370_v42, %v834_v43  ;;  %v1582_v45 = vpop.f32.mrb[9].mxu0 }
 0x652   :  { %v837_v46 = vpop.f32.mrb[10].mxu0 }
 0x653   :  { %v838_v47 = vadd.f32 %v1370_v42, %v837_v46  ;;  %v1583_v48 = vpop.f32.mrb[11].mxu0  ;;  %v2655_v49 = vadd.f32 %v835_v44, %v2628_v12  ;;  %v1747_v12 = vld [vmem:[#allocation29 + $0x18] sm:$0xff]  }
 0x655   :  { %v2658_v50 = vadd.f32 %v838_v47, %v2630_v13  ;;  %v1748_v13 = vld [vmem:[#allocation29 + $0x20] sm:$0xff]  }
 0x657   :  { %v843_v51 = vpack.c.bf16 %v2658_v50, %v2655_v49 }
 0x659   :  { %1601 = vmatmul.mubr.bf16.vlgmr.msra.gmra.mrb[8].mxu1 %v843_v51 }
 0x65a   :  { %1640 = vmatprep.mubr.msk.bf16.mxu1 %vm2196_vm0, %v2195_v0  ;;  %1625 = vmatpush3.bf16.msra.mxu1 %v1736_v54 }
 0x65b   :  { %1626 = vmatprep.subr.bf16.mxu1 %v2195_v0 }
 0x65e   :  { %1627 = vmatpush3.bf16.msra.mxu1 %v1737_v55 }
 0x65f   :  { %1628 = vmatprep.subr.bf16.mxu1 %v2195_v0 }
 0x662   :  { %1629 = vmatpush3.bf16.msra.mxu1 %v1738_v56 }
 0x663   :  { %1630 = vmatprep.subr.bf16.mxu1 %v2195_v0 }
 0x666   :  { %1631 = vmatpush3.bf16.msra.mxu1 %v1739_v57 }
 0x667   :  { %1632 = vmatprep.subr.bf16.mxu1 %v2195_v0 }
 0x66a   :  { %1633 = vmatpush3.bf16.msra.mxu1 %v1740_v58 }
 0x66b   :  { %1634 = vmatprep.subr.bf16.mxu1 %v2195_v0 }
 0x66e   :  { %1635 = vmatpush3.bf16.msra.mxu1 %v1741_v59 }
 0x66f   :  { %1636 = vmatprep.subr.bf16.mxu1 %v2195_v0 }
 0x672   :  { %1637 = vmatpush3.bf16.msra.mxu1 %v1742_v7 }
 0x673   :  { %1638 = vmatprep.subr.bf16.mxu1 %v2195_v0 }
 0x676   :  { %1639 = vmatpush3.bf16.msra.mxu1 %v1743_v8 }
 0x72c   :  { %v949_v61 = vpop.f32.mrb[8].mxu1 }
 0x72d   :  { %v950_v62 = vadd.f32 %v1379_v60, %v949_v61  ;;  %v1602_v63 = vpop.f32.mrb[9].mxu1 }
 0x72e   :  { %v952_v1 = vpop.f32.mrb[10].mxu1 }
 0x72f   :  { %v953_v2 = vadd.f32 %v1379_v60, %v952_v1  ;;  %v1603_v3 = vpop.f32.mrb[11].mxu1  ;;  %v956_v4 = vmax.f32 %v950_v62, 0.0 }
 0x731   :  { %v957_v5 = vmax.f32 %v953_v2, 0.0 }
 0x733   :  { %v958_v6 = vpack.c.bf16 %v957_v5, %v956_v4 }
 0x735   :  { %1621 = vmatmul.mubr.bf16.vlgmr.msra.gmra.mrb[12].mxu0 %v958_v6 }
 0x736   :  { %1660 = vmatprep.mubr.msk.bf16.mxu0 %vm2196_vm0, %v2195_v0  ;;  %1645 = vmatpush3.bf16.msra.mxu0 %v1744_v9 }
 0x737   :  { %1646 = vmatprep.subr.bf16.mxu0 %v2195_v0 }
 0x73a   :  { %1647 = vmatpush3.bf16.msra.mxu0 %v1745_v10 }
 0x73b   :  { %1648 = vmatprep.subr.bf16.mxu0 %v2195_v0 }
 0x73e   :  { %1649 = vmatpush3.bf16.msra.mxu0 %v1746_v11 }
 0x73f   :  { %1650 = vmatprep.subr.bf16.mxu0 %v2195_v0 }
 0x742   :  { %1651 = vmatpush3.bf16.msra.mxu0 %v1747_v12 }
 0x743   :  { %1652 = vmatprep.subr.bf16.mxu0 %v2195_v0 }
 0x746   :  { %1653 = vmatpush3.bf16.msra.mxu0 %v1748_v13 }
 0x747   :  { %1654 = vmatprep.subr.bf16.mxu0 %v2195_v0 }
 0x74a   :  { %1655 = vmatpush3.bf16.msra.mxu0 %v1749_v14 }
 0x74b   :  { %1656 = vmatprep.subr.bf16.mxu0 %v2195_v0 }
 0x74e   :  { %1657 = vmatpush3.bf16.msra.mxu0 %v1750_v25 }
 0x74f   :  { %1658 = vmatprep.subr.bf16.mxu0 %v2195_v0  ;;  %v1406_v0 = vld [vmem:[%s2749_s20] ss:$0 sm:$0xff] }
 0x752   :  { %1659 = vmatpush3.bf16.msra.mxu0 %v1751_v26 }
 0x808   :  { %v1064_v16 = vpop.f32.mrb[12].mxu0 }
 0x809   :  { %v1065_v17 = vadd.f32 %v1388_v15, %v1064_v16  ;;  %v1622_v18 = vpop.f32.mrb[13].mxu0 }
 0x80a   :  { %v1067_v19 = vpop.f32.mrb[14].mxu0 }
 0x80b   :  { %v1068_v20 = vadd.f32 %v1388_v15, %v1067_v19  ;;  %v1623_v21 = vpop.f32.mrb[15].mxu0  ;;  %v1071_v22 = vadd.f32 %v1065_v17, %v2655_v49 }
 0x80d   :  { %v1072_v23 = vadd.f32 %v1068_v20, %v2658_v50 }
 0x80f   :  { %v1073_v24 = vpack.c.bf16 %v1072_v23, %v1071_v22 }
 0x811   :  { %1641 = vmatmul.mubr.bf16.vlgmr.msra.gmra.mrb[12].mxu1 %v1073_v24 }
 0x8e4   :  { %v1179_v28 = vpop.f32.mrb[12].mxu1 }
 0x8e5   :  { %v1180_v29 = vadd.f32 %v1397_v27, %v1179_v28  ;;  %v1642_v30 = vpop.f32.mrb[13].mxu1 }
 0x8e6   :  { %v1182_v31 = vpop.f32.mrb[14].mxu1 }
 0x8e7   :  { %v1183_v32 = vadd.f32 %v1397_v27, %v1182_v31  ;;  %v1643_v33 = vpop.f32.mrb[15].mxu1  ;;  %v1186_v34 = vmax.f32 %v1180_v29, 0.0 }
 0x8e9   :  { %v1187_v35 = vmax.f32 %v1183_v32, 0.0 }
 0x8eb   :  { %v1188_v36 = vpack.c.bf16 %v1187_v35, %v1186_v34 }
 0x8ed   :  { %1661 = vmatmul.mubr.bf16.vlgmr.msra.gmra.mrb[16].mxu0 %v1188_v36 }
 0x9c0   :  { %v1294_v37 = vpop.f32.mrb[16].mxu0 }
 0x9c1   :  { %v1662_v38 = vpop.f32.mrb[17].mxu0  ;;  %v1295_v40 = vadd.f32 %v1406_v0, %v1294_v37 }
 0x9c2   :  { %v1297_v39 = vpop.f32.mrb[18].mxu0 }
 0x9c3   :  { %v1298_v41 = vadd.f32 %v1406_v0, %v1297_v39  ;;  %v1663_v42 = vpop.f32.mrb[19].mxu0 }
 0x9c5   :  { %v1422_v43 = vpack.c.bf16 %v1298_v41, %v1295_v40 }
 0x9c7   :  { %1423 = vst [vmem:[#allocation30] sm:$0xff] %v1422_v43  }
 0x9c8   :  { %2145 = shalt.err (!%p2142_p0)
}
 0x9c9   :  { %s2146_s19 = scalar_lea.hbm %s2750_s21, 128 }
 0x9ca   :  { %p2147_p1 = scmp.ne.s32.totalorder %s2750_s21, %s2146_s19  ;;  %p2150_p2 = scmp.lt.u32.totalorder %s2146_s19, %s2750_s21 }
 0x9cc   :  { %p2152_p3 = pnand %p2150_p2, %p2147_p1 }
 0x9ce   :  { %2155 = shalt.err (!%p2152_p3)
}
 0x9cf   :  { %1322 = dma.vmem_to_hbm [thread:$0]  %s1317_s15, 128, %s2750_s21, [#allocation5], %s2770_s22, %s2770_s22, %s2769_s30  }
 0x9d0   :  { %2174 = dma.done.wait [#allocation5], 128  }
 0x9d1   :  { %2175 = vsyncadd [#allocation5], 4294967168 }
 0x9d2   :  { %1326 = vsyncpa [#allocation4], 1 }
 0x9d3   :  { %1327 = vsyncpa [#allocation7], 1 }
 0x9d4   :  { %1328 = vsyncpa [#allocation10], 1 }
 0x9d5   :  { %1329 = vsyncpa [#allocation13], 1 }
 0x9d6   :  { %1330 = vsyncpa [#allocation16], 1 }
 0x9d7   :  { %1331 = vsyncpa [#allocation19], 1 }
 0x9d8   :  { %1332 = vsyncpa [#allocation22], 1 }
 0x9d9   :  { %1333 = vsyncpa [#allocation25], 1 }
 0x9da   :  { %1334 = vsyncpa [#allocation28], 1 }
 0x9db   :  { %1335 = vsyncpa [#allocation5], 1 }

</bundles_post_ra>
